<compile_context>
chip_gen: v5e
topology: v5e:2x2
jax: 0.10.0
libtpu: 0.0.40
codegen_flags: <defaults>
</compile_context>

<pallas_src>
import math
import functools

import jax
import jax.numpy as jnp
from jax import lax
from jax.experimental import pallas as pl
from jax.experimental.pallas import tpu as pltpu

SAMPLE_RATE = 16000  # DataProperties.get('sample_rate') surrogate
F0_FLOOR = 50.0
F0_CEIL = 550.0
MIN_OVERLAP = 16     # require >= this many valid samples per lag (bounds variance of long lags)


def _lag_grid(sample_rate: int, hop_length: int):
    W = hop_length
    lag_min = max(2, int(math.ceil(sample_rate / F0_CEIL)))
    lag_max = min(W - MIN_OVERLAP, int(sample_rate // F0_FLOOR))
    step = max(1, (lag_max - lag_min) // 24)
    return list(range(lag_min, lag_max + 1, step))


def _make_pitch_kernel(sample_rate: int, hop_length: int, n_channels: int, lags):
    W = hop_length
    inv_c = 1.0 / float(n_channels)

    def kernel(x_ref, pitch_ref, per_ref):
        # x_ref: (C, TILE_F, W) f32   pitch_ref / per_ref: (TILE_F, 1) f32
        # ---- 1. channel mean (x.mean(dim=1)): leading-axis adds, pure VPU ----
        f = x_ref[0].astype(jnp.float32)
        for c in range(1, n_channels):
            f = f + x_ref[c].astype(jnp.float32)
        f = f * jnp.float32(inv_c)                                    # (TILE_F, W)

        # hoisted constants (not rebuilt per lag)
        idx = lax.broadcasted_iota(jnp.int32, (W, 1), 0)              # sample index column
        ones_col = jnp.ones((W, 1), jnp.float32)

        # ---- 2. frame energy R[0] via MXU row-sum (reduction off the XLU) ----
        energy = jnp.dot(f * f, ones_col,
                         preferred_element_type=jnp.float32)          # (TILE_F, 1)

        best_corr = jnp.full((f.shape[0], 1), -1e30, jnp.float32)
        best_lag = jnp.full((f.shape[0], 1), float(lags[0]), jnp.float32)

        # ---- 3. lag search: roll (XLU) + multiply (VPU) + masked/compensated MXU matvec ----
        for lag in lags:                          # static unroll, ~25-30 lags
            # rolled[:, i] = f[:, (i + lag) % W]  (jnp.roll semantics, positive shift)
            rolled = pltpu.roll(f, shift=W - lag, axis=1)
            comp = float(W) / float(W - lag)      # length compensation for the W-lag window
            col = jnp.where(idx < (W - lag), jnp.float32(comp), jnp.float32(0.0))
            corr = jnp.dot(f * rolled, col,
                           preferred_element_type=jnp.float32)        # (TILE_F, 1)
            upd = corr > best_corr
            best_corr = jnp.maximum(best_corr, corr)
            best_lag = jnp.where(upd, jnp.float32(lag), best_lag)

        # ---- 4. finalize: single EUP reciprocal (division hoisted out of the loop) ----
        inv_e = pl.reciprocal(energy + jnp.float32(1e-8), approx=True)
        pitch_ref[...] = (jnp.float32(sample_rate) / best_lag).astype(jnp.float32)
        per_ref[...] = jnp.clip(best_corr * inv_e, 0.0, 1.0).astype(jnp.float32)

    return kernel


@functools.partial(jax.jit, static_argnames=("hop_length", "return_periodicity"))
def pitch_encoder_forward(x, hop_length: int = 128, return_periodicity: bool = True):
    """Forward pass of PitchEncoder (algorithm='dio' surrogate)."""
    assert x.shape[-1] >= hop_length
    if x.ndim == 2:                      # (B, T) -> (B, 1, T)  (the module's unsqueeze(1))
        x = x[:, None, :]
    B, C, T = x.shape
    W = hop_length

    # pyworld frame-count convention: NF = T // hop + 1
    NF = T // W + 1
    lags = _lag_grid(SAMPLE_RATE, W)

    # frame-tile size: large enough to pipeline, multiple of 8 (sublane tiling)
    TILE_F = 256 if NF >= 256 else max(8, ((NF + 7) // 8) * 8)
    NF_pad = ((NF + TILE_F - 1) // TILE_F) * TILE_F
    n_tiles = NF_pad // TILE_F

    pad = NF_pad * W - T
    x_p = jnp.pad(x.astype(jnp.float32), ((0, 0), (0, 0), (0, pad)))
    x4 = x_p.reshape(B, C, NF_pad, W)    # pure reshape, no data movement

    kernel = _make_pitch_kernel(SAMPLE_RATE, W, C, lags)

    n_lags = len(lags)
    per_frame_flops = C * W + 3 * W + n_lags * (3 * W + 4) + 2 * W + 16
    cost = pl.CostEstimate(
        flops=int(B * NF_pad * per_frame_flops),
        transcendentals=int(B * NF_pad),
        bytes_accessed=int(B * C * NF_pad * W * 4 + 2 * B * NF_pad * 4),
    )

    pitch, periodicity = pl.pallas_call(
        kernel,
        out_shape=(
            jax.ShapeDtypeStruct((B, NF_pad, 1), jnp.float32),
            jax.ShapeDtypeStruct((B, NF_pad, 1), jnp.float32),
        ),
        grid=(B, n_tiles),
        in_specs=[pl.BlockSpec((None, C, TILE_F, W), lambda b, t: (b, 0, t, 0))],
        out_specs=(
            pl.BlockSpec((None, TILE_F, 1), lambda b, t: (b, t, 0)),
            pl.BlockSpec((None, TILE_F, 1), lambda b, t: (b, t, 0)),
        ),
        compiler_params=pltpu.CompilerParams(
            dimension_semantics=("parallel", "parallel"),
            vmem_limit_bytes=32 * 1024 * 1024,
        ),
        cost_estimate=cost,
    )(x4)

    pitch = pitch[:, :NF, :]             # (B, NF, 1)
    periodicity = periodicity[:, :NF, :]
    if return_periodicity:
        return pitch, periodicity
    return pitch


if __name__ == "__main__":
    key = jax.random.PRNGKey(0)
    B, C, T = 2, 4, 1024
    hop = 128

    # deterministic test signal: 220 Hz sine + small noise, shared across channels
    t = jnp.arange(T, dtype=jnp.float32) / SAMPLE_RATE
    sine = jnp.sin(2.0 * jnp.pi * 220.0 * t)
    noise = 0.01 * jax.random.normal(key, (B, C, T), dtype=jnp.float32)
    x = sine[None, None, :] + noise      # (B, C, T)

    pitch, periodicity = pitch_encoder_forward(x, hop_length=hop, return_periodicity=True)
    jax.block_until_ready((pitch, periodicity))

    n_frames = T // hop + 1
    assert pitch.shape == (B, n_frames, 1), pitch.shape
    assert periodicity.shape == (B, n_frames, 1), periodicity.shape
    assert pitch.dtype == jnp.float32 and periodicity.dtype == jnp.float32
    assert bool(jnp.all(jnp.isfinite(pitch))) and bool(jnp.all(jnp.isfinite(periodicity)))
    assert bool(jnp.all(periodicity >= 0.0)) and bool(jnp.all(periodicity <= 1.0))
    # frames 0..7 contain real 220 Hz audio: surrogate estimate should land in a sane band
    real_pitch = pitch[:, :T // hop, 0]
    assert bool(jnp.all(real_pitch > 180.0)) and bool(jnp.all(real_pitch < 270.0)), real_pitch

    print("KERNEL_OK")
</pallas_src>

<mosaic_0001>
module attributes {stable_mosaic.version = 11 : i64} {
  func.func @kernel(%arg0: i32, %arg1: i32, %arg2: memref<1x4x16x128xf32, #tpu.memory_space<vmem>>, %arg3: memref<1x16x1xf32, #tpu.memory_space<vmem>>, %arg4: memref<1x16x1xf32, #tpu.memory_space<vmem>>) attributes {dimension_semantics = [#tpu.dimension_semantics<parallel>, #tpu.dimension_semantics<parallel>], iteration_bounds = array<i64: 2, 1>, scalar_prefetch = 0 : i64, scratch_operands = 0 : i64, tpu.core_type = #tpu.core_type<tc>, window_params = [{transform_indices = @transform_0, window_bounds = array<i64: 1, 4, 16, 128>}, {transform_indices = @transform_1, window_bounds = array<i64: 1, 16, 1>}, {transform_indices = @transform_2, window_bounds = array<i64: 1, 16, 1>}]} {
    %c0 = arith.constant 0 : index
    %c0_0 = arith.constant 0 : index
    %c0_1 = arith.constant 0 : index
    %c0_2 = arith.constant 0 : index
    %0 = vector.load %arg2[%c0, %c0_0, %c0_1, %c0_2] : memref<1x4x16x128xf32, #tpu.memory_space<vmem>>, vector<1x1x16x128xf32>
    %1 = vector.shape_cast %0 : vector<1x1x16x128xf32> to vector<16x128xf32>
    %c0_3 = arith.constant 0 : index
    %c1 = arith.constant 1 : index
    %c0_4 = arith.constant 0 : index
    %c0_5 = arith.constant 0 : index
    %2 = vector.load %arg2[%c0_3, %c1, %c0_4, %c0_5] : memref<1x4x16x128xf32, #tpu.memory_space<vmem>>, vector<1x1x16x128xf32>
    %3 = vector.shape_cast %2 : vector<1x1x16x128xf32> to vector<16x128xf32>
    %4 = arith.addf %1, %3 : vector<16x128xf32>
    %c0_6 = arith.constant 0 : index
    %c2 = arith.constant 2 : index
    %c0_7 = arith.constant 0 : index
    %c0_8 = arith.constant 0 : index
    %5 = vector.load %arg2[%c0_6, %c2, %c0_7, %c0_8] : memref<1x4x16x128xf32, #tpu.memory_space<vmem>>, vector<1x1x16x128xf32>
    %6 = vector.shape_cast %5 : vector<1x1x16x128xf32> to vector<16x128xf32>
    %7 = arith.addf %4, %6 : vector<16x128xf32>
    %c0_9 = arith.constant 0 : index
    %c3 = arith.constant 3 : index
    %c0_10 = arith.constant 0 : index
    %c0_11 = arith.constant 0 : index
    %8 = vector.load %arg2[%c0_9, %c3, %c0_10, %c0_11] : memref<1x4x16x128xf32, #tpu.memory_space<vmem>>, vector<1x1x16x128xf32>
    %9 = vector.shape_cast %8 : vector<1x1x16x128xf32> to vector<16x128xf32>
    %10 = arith.addf %7, %9 : vector<16x128xf32>
    %cst = arith.constant 2.500000e-01 : f32
    %11 = vector.broadcast %cst : f32 to vector<16x128xf32>
    %12 = arith.mulf %10, %11 : vector<16x128xf32>
    %13 = tpu.iota {dimensions = array<i32: 0>} : vector<128x1xi32>
    %cst_12 = arith.constant 1.000000e+00 : f32
    %14 = vector.broadcast %cst_12 : f32 to vector<128x1xf32>
    %15 = arith.mulf %12, %12 : vector<16x128xf32>
    %cst_13 = arith.constant dense<0.000000e+00> : vector<16x1xf32>
    %16 = tpu.matmul %15, %14, %cst_13 {dimension_numbers = #tpu.dot_dimension_numbers<[1], [0], [0], [1], [0, 0, 1, 1], [], []>} : vector<16x128xf32>, vector<128x1xf32>, vector<16x1xf32> -> vector<16x1xf32>
    %cst_14 = arith.constant -1.000000e+30 : f32
    %17 = vector.broadcast %cst_14 : f32 to vector<16x1xf32>
    %cst_15 = arith.constant 3.000000e+01 : f32
    %18 = vector.broadcast %cst_15 : f32 to vector<16x1xf32>
    %c98_i32 = arith.constant 98 : i32
    %19 = tpu.dynamic_rotate %12 by %c98_i32 dim 1 : vector<16x128xf32>, i32 -> vector<16x128xf32>
    %c98_i32_16 = arith.constant 98 : i32
    %20 = vector.broadcast %c98_i32_16 : i32 to vector<128x1xi32>
    %21 = arith.cmpi slt, %13, %20 : vector<128x1xi32>
    %cst_17 = arith.constant 1.30612242 : f32
    %cst_18 = arith.constant 0.000000e+00 : f32
    %22 = vector.broadcast %cst_17 : f32 to vector<128x1xf32>
    %23 = vector.broadcast %cst_18 : f32 to vector<128x1xf32>
    %24 = arith.select %21, %22, %23 : vector<128x1xi1>, vector<128x1xf32>
    %25 = arith.mulf %12, %19 : vector<16x128xf32>
    %cst_19 = arith.constant dense<0.000000e+00> : vector<16x1xf32>
    %26 = tpu.matmul %25, %24, %cst_19 {dimension_numbers = #tpu.dot_dimension_numbers<[1], [0], [0], [1], [0, 0, 1, 1], [], []>} : vector<16x128xf32>, vector<128x1xf32>, vector<16x1xf32> -> vector<16x1xf32>
    %27 = arith.cmpf ogt, %26, %17 : vector<16x1xf32>
    %28 = arith.maximumf %17, %26 : vector<16x1xf32>
    %cst_20 = arith.constant 3.000000e+01 : f32
    %29 = vector.broadcast %cst_20 : f32 to vector<16x1xf32>
    %30 = arith.select %27, %29, %18 : vector<16x1xi1>, vector<16x1xf32>
    %c95_i32 = arith.constant 95 : i32
    %31 = tpu.dynamic_rotate %12 by %c95_i32 dim 1 : vector<16x128xf32>, i32 -> vector<16x128xf32>
    %c95_i32_21 = arith.constant 95 : i32
    %32 = vector.broadcast %c95_i32_21 : i32 to vector<128x1xi32>
    %33 = arith.cmpi slt, %13, %32 : vector<128x1xi32>
    %cst_22 = arith.constant 1.34736848 : f32
    %cst_23 = arith.constant 0.000000e+00 : f32
    %34 = vector.broadcast %cst_22 : f32 to vector<128x1xf32>
    %35 = vector.broadcast %cst_23 : f32 to vector<128x1xf32>
    %36 = arith.select %33, %34, %35 : vector<128x1xi1>, vector<128x1xf32>
    %37 = arith.mulf %12, %31 : vector<16x128xf32>
    %cst_24 = arith.constant dense<0.000000e+00> : vector<16x1xf32>
    %38 = tpu.matmul %37, %36, %cst_24 {dimension_numbers = #tpu.dot_dimension_numbers<[1], [0], [0], [1], [0, 0, 1, 1], [], []>} : vector<16x128xf32>, vector<128x1xf32>, vector<16x1xf32> -> vector<16x1xf32>
    %39 = arith.cmpf ogt, %38, %28 : vector<16x1xf32>
    %40 = arith.maximumf %28, %38 : vector<16x1xf32>
    %cst_25 = arith.constant 3.300000e+01 : f32
    %41 = vector.broadcast %cst_25 : f32 to vector<16x1xf32>
    %42 = arith.select %39, %41, %30 : vector<16x1xi1>, vector<16x1xf32>
    %c92_i32 = arith.constant 92 : i32
    %43 = tpu.dynamic_rotate %12 by %c92_i32 dim 1 : vector<16x128xf32>, i32 -> vector<16x128xf32>
    %c92_i32_26 = arith.constant 92 : i32
    %44 = vector.broadcast %c92_i32_26 : i32 to vector<128x1xi32>
    %45 = arith.cmpi slt, %13, %44 : vector<128x1xi32>
    %cst_27 = arith.constant 1.39130437 : f32
    %cst_28 = arith.constant 0.000000e+00 : f32
    %46 = vector.broadcast %cst_27 : f32 to vector<128x1xf32>
    %47 = vector.broadcast %cst_28 : f32 to vector<128x1xf32>
    %48 = arith.select %45, %46, %47 : vector<128x1xi1>, vector<128x1xf32>
    %49 = arith.mulf %12, %43 : vector<16x128xf32>
    %cst_29 = arith.constant dense<0.000000e+00> : vector<16x1xf32>
    %50 = tpu.matmul %49, %48, %cst_29 {dimension_numbers = #tpu.dot_dimension_numbers<[1], [0], [0], [1], [0, 0, 1, 1], [], []>} : vector<16x128xf32>, vector<128x1xf32>, vector<16x1xf32> -> vector<16x1xf32>
    %51 = arith.cmpf ogt, %50, %40 : vector<16x1xf32>
    %52 = arith.maximumf %40, %50 : vector<16x1xf32>
    %cst_30 = arith.constant 3.600000e+01 : f32
    %53 = vector.broadcast %cst_30 : f32 to vector<16x1xf32>
    %54 = arith.select %51, %53, %42 : vector<16x1xi1>, vector<16x1xf32>
    %c89_i32 = arith.constant 89 : i32
    %55 = tpu.dynamic_rotate %12 by %c89_i32 dim 1 : vector<16x128xf32>, i32 -> vector<16x128xf32>
    %c89_i32_31 = arith.constant 89 : i32
    %56 = vector.broadcast %c89_i32_31 : i32 to vector<128x1xi32>
    %57 = arith.cmpi slt, %13, %56 : vector<128x1xi32>
    %cst_32 = arith.constant 1.43820226 : f32
    %cst_33 = arith.constant 0.000000e+00 : f32
    %58 = vector.broadcast %cst_32 : f32 to vector<128x1xf32>
    %59 = vector.broadcast %cst_33 : f32 to vector<128x1xf32>
    %60 = arith.select %57, %58, %59 : vector<128x1xi1>, vector<128x1xf32>
    %61 = arith.mulf %12, %55 : vector<16x128xf32>
    %cst_34 = arith.constant dense<0.000000e+00> : vector<16x1xf32>
    %62 = tpu.matmul %61, %60, %cst_34 {dimension_numbers = #tpu.dot_dimension_numbers<[1], [0], [0], [1], [0, 0, 1, 1], [], []>} : vector<16x128xf32>, vector<128x1xf32>, vector<16x1xf32> -> vector<16x1xf32>
    %63 = arith.cmpf ogt, %62, %52 : vector<16x1xf32>
    %64 = arith.maximumf %52, %62 : vector<16x1xf32>
    %cst_35 = arith.constant 3.900000e+01 : f32
    %65 = vector.broadcast %cst_35 : f32 to vector<16x1xf32>
    %66 = arith.select %63, %65, %54 : vector<16x1xi1>, vector<16x1xf32>
    %c86_i32 = arith.constant 86 : i32
    %67 = tpu.dynamic_rotate %12 by %c86_i32 dim 1 : vector<16x128xf32>, i32 -> vector<16x128xf32>
    %c86_i32_36 = arith.constant 86 : i32
    %68 = vector.broadcast %c86_i32_36 : i32 to vector<128x1xi32>
    %69 = arith.cmpi slt, %13, %68 : vector<128x1xi32>
    %cst_37 = arith.constant 1.48837209 : f32
    %cst_38 = arith.constant 0.000000e+00 : f32
    %70 = vector.broadcast %cst_37 : f32 to vector<128x1xf32>
    %71 = vector.broadcast %cst_38 : f32 to vector<128x1xf32>
    %72 = arith.select %69, %70, %71 : vector<128x1xi1>, vector<128x1xf32>
    %73 = arith.mulf %12, %67 : vector<16x128xf32>
    %cst_39 = arith.constant dense<0.000000e+00> : vector<16x1xf32>
    %74 = tpu.matmul %73, %72, %cst_39 {dimension_numbers = #tpu.dot_dimension_numbers<[1], [0], [0], [1], [0, 0, 1, 1], [], []>} : vector<16x128xf32>, vector<128x1xf32>, vector<16x1xf32> -> vector<16x1xf32>
    %75 = arith.cmpf ogt, %74, %64 : vector<16x1xf32>
    %76 = arith.maximumf %64, %74 : vector<16x1xf32>
    %cst_40 = arith.constant 4.200000e+01 : f32
    %77 = vector.broadcast %cst_40 : f32 to vector<16x1xf32>
    %78 = arith.select %75, %77, %66 : vector<16x1xi1>, vector<16x1xf32>
    %c83_i32 = arith.constant 83 : i32
    %79 = tpu.dynamic_rotate %12 by %c83_i32 dim 1 : vector<16x128xf32>, i32 -> vector<16x128xf32>
    %c83_i32_41 = arith.constant 83 : i32
    %80 = vector.broadcast %c83_i32_41 : i32 to vector<128x1xi32>
    %81 = arith.cmpi slt, %13, %80 : vector<128x1xi32>
    %cst_42 = arith.constant 1.54216862 : f32
    %cst_43 = arith.constant 0.000000e+00 : f32
    %82 = vector.broadcast %cst_42 : f32 to vector<128x1xf32>
    %83 = vector.broadcast %cst_43 : f32 to vector<128x1xf32>
    %84 = arith.select %81, %82, %83 : vector<128x1xi1>, vector<128x1xf32>
    %85 = arith.mulf %12, %79 : vector<16x128xf32>
    %cst_44 = arith.constant dense<0.000000e+00> : vector<16x1xf32>
    %86 = tpu.matmul %85, %84, %cst_44 {dimension_numbers = #tpu.dot_dimension_numbers<[1], [0], [0], [1], [0, 0, 1, 1], [], []>} : vector<16x128xf32>, vector<128x1xf32>, vector<16x1xf32> -> vector<16x1xf32>
    %87 = arith.cmpf ogt, %86, %76 : vector<16x1xf32>
    %88 = arith.maximumf %76, %86 : vector<16x1xf32>
    %cst_45 = arith.constant 4.500000e+01 : f32
    %89 = vector.broadcast %cst_45 : f32 to vector<16x1xf32>
    %90 = arith.select %87, %89, %78 : vector<16x1xi1>, vector<16x1xf32>
    %c80_i32 = arith.constant 80 : i32
    %91 = tpu.dynamic_rotate %12 by %c80_i32 dim 1 : vector<16x128xf32>, i32 -> vector<16x128xf32>
    %c80_i32_46 = arith.constant 80 : i32
    %92 = vector.broadcast %c80_i32_46 : i32 to vector<128x1xi32>
    %93 = arith.cmpi slt, %13, %92 : vector<128x1xi32>
    %cst_47 = arith.constant 1.600000e+00 : f32
    %cst_48 = arith.constant 0.000000e+00 : f32
    %94 = vector.broadcast %cst_47 : f32 to vector<128x1xf32>
    %95 = vector.broadcast %cst_48 : f32 to vector<128x1xf32>
    %96 = arith.select %93, %94, %95 : vector<128x1xi1>, vector<128x1xf32>
    %97 = arith.mulf %12, %91 : vector<16x128xf32>
    %cst_49 = arith.constant dense<0.000000e+00> : vector<16x1xf32>
    %98 = tpu.matmul %97, %96, %cst_49 {dimension_numbers = #tpu.dot_dimension_numbers<[1], [0], [0], [1], [0, 0, 1, 1], [], []>} : vector<16x128xf32>, vector<128x1xf32>, vector<16x1xf32> -> vector<16x1xf32>
    %99 = arith.cmpf ogt, %98, %88 : vector<16x1xf32>
    %100 = arith.maximumf %88, %98 : vector<16x1xf32>
    %cst_50 = arith.constant 4.800000e+01 : f32
    %101 = vector.broadcast %cst_50 : f32 to vector<16x1xf32>
    %102 = arith.select %99, %101, %90 : vector<16x1xi1>, vector<16x1xf32>
    %c77_i32 = arith.constant 77 : i32
    %103 = tpu.dynamic_rotate %12 by %c77_i32 dim 1 : vector<16x128xf32>, i32 -> vector<16x128xf32>
    %c77_i32_51 = arith.constant 77 : i32
    %104 = vector.broadcast %c77_i32_51 : i32 to vector<128x1xi32>
    %105 = arith.cmpi slt, %13, %104 : vector<128x1xi32>
    %cst_52 = arith.constant 1.66233766 : f32
    %cst_53 = arith.constant 0.000000e+00 : f32
    %106 = vector.broadcast %cst_52 : f32 to vector<128x1xf32>
    %107 = vector.broadcast %cst_53 : f32 to vector<128x1xf32>
    %108 = arith.select %105, %106, %107 : vector<128x1xi1>, vector<128x1xf32>
    %109 = arith.mulf %12, %103 : vector<16x128xf32>
    %cst_54 = arith.constant dense<0.000000e+00> : vector<16x1xf32>
    %110 = tpu.matmul %109, %108, %cst_54 {dimension_numbers = #tpu.dot_dimension_numbers<[1], [0], [0], [1], [0, 0, 1, 1], [], []>} : vector<16x128xf32>, vector<128x1xf32>, vector<16x1xf32> -> vector<16x1xf32>
    %111 = arith.cmpf ogt, %110, %100 : vector<16x1xf32>
    %112 = arith.maximumf %100, %110 : vector<16x1xf32>
    %cst_55 = arith.constant 5.100000e+01 : f32
    %113 = vector.broadcast %cst_55 : f32 to vector<16x1xf32>
    %114 = arith.select %111, %113, %102 : vector<16x1xi1>, vector<16x1xf32>
    %c74_i32 = arith.constant 74 : i32
    %115 = tpu.dynamic_rotate %12 by %c74_i32 dim 1 : vector<16x128xf32>, i32 -> vector<16x128xf32>
    %c74_i32_56 = arith.constant 74 : i32
    %116 = vector.broadcast %c74_i32_56 : i32 to vector<128x1xi32>
    %117 = arith.cmpi slt, %13, %116 : vector<128x1xi32>
    %cst_57 = arith.constant 1.72972977 : f32
    %cst_58 = arith.constant 0.000000e+00 : f32
    %118 = vector.broadcast %cst_57 : f32 to vector<128x1xf32>
    %119 = vector.broadcast %cst_58 : f32 to vector<128x1xf32>
    %120 = arith.select %117, %118, %119 : vector<128x1xi1>, vector<128x1xf32>
    %121 = arith.mulf %12, %115 : vector<16x128xf32>
    %cst_59 = arith.constant dense<0.000000e+00> : vector<16x1xf32>
    %122 = tpu.matmul %121, %120, %cst_59 {dimension_numbers = #tpu.dot_dimension_numbers<[1], [0], [0], [1], [0, 0, 1, 1], [], []>} : vector<16x128xf32>, vector<128x1xf32>, vector<16x1xf32> -> vector<16x1xf32>
    %123 = arith.cmpf ogt, %122, %112 : vector<16x1xf32>
    %124 = arith.maximumf %112, %122 : vector<16x1xf32>
    %cst_60 = arith.constant 5.400000e+01 : f32
    %125 = vector.broadcast %cst_60 : f32 to vector<16x1xf32>
    %126 = arith.select %123, %125, %114 : vector<16x1xi1>, vector<16x1xf32>
    %c71_i32 = arith.constant 71 : i32
    %127 = tpu.dynamic_rotate %12 by %c71_i32 dim 1 : vector<16x128xf32>, i32 -> vector<16x128xf32>
    %c71_i32_61 = arith.constant 71 : i32
    %128 = vector.broadcast %c71_i32_61 : i32 to vector<128x1xi32>
    %129 = arith.cmpi slt, %13, %128 : vector<128x1xi32>
    %cst_62 = arith.constant 1.80281687 : f32
    %cst_63 = arith.constant 0.000000e+00 : f32
    %130 = vector.broadcast %cst_62 : f32 to vector<128x1xf32>
    %131 = vector.broadcast %cst_63 : f32 to vector<128x1xf32>
    %132 = arith.select %129, %130, %131 : vector<128x1xi1>, vector<128x1xf32>
    %133 = arith.mulf %12, %127 : vector<16x128xf32>
    %cst_64 = arith.constant dense<0.000000e+00> : vector<16x1xf32>
    %134 = tpu.matmul %133, %132, %cst_64 {dimension_numbers = #tpu.dot_dimension_numbers<[1], [0], [0], [1], [0, 0, 1, 1], [], []>} : vector<16x128xf32>, vector<128x1xf32>, vector<16x1xf32> -> vector<16x1xf32>
    %135 = arith.cmpf ogt, %134, %124 : vector<16x1xf32>
    %136 = arith.maximumf %124, %134 : vector<16x1xf32>
    %cst_65 = arith.constant 5.700000e+01 : f32
    %137 = vector.broadcast %cst_65 : f32 to vector<16x1xf32>
    %138 = arith.select %135, %137, %126 : vector<16x1xi1>, vector<16x1xf32>
    %c68_i32 = arith.constant 68 : i32
    %139 = tpu.dynamic_rotate %12 by %c68_i32 dim 1 : vector<16x128xf32>, i32 -> vector<16x128xf32>
    %c68_i32_66 = arith.constant 68 : i32
    %140 = vector.broadcast %c68_i32_66 : i32 to vector<128x1xi32>
    %141 = arith.cmpi slt, %13, %140 : vector<128x1xi32>
    %cst_67 = arith.constant 1.88235295 : f32
    %cst_68 = arith.constant 0.000000e+00 : f32
    %142 = vector.broadcast %cst_67 : f32 to vector<128x1xf32>
    %143 = vector.broadcast %cst_68 : f32 to vector<128x1xf32>
    %144 = arith.select %141, %142, %143 : vector<128x1xi1>, vector<128x1xf32>
    %145 = arith.mulf %12, %139 : vector<16x128xf32>
    %cst_69 = arith.constant dense<0.000000e+00> : vector<16x1xf32>
    %146 = tpu.matmul %145, %144, %cst_69 {dimension_numbers = #tpu.dot_dimension_numbers<[1], [0], [0], [1], [0, 0, 1, 1], [], []>} : vector<16x128xf32>, vector<128x1xf32>, vector<16x1xf32> -> vector<16x1xf32>
    %147 = arith.cmpf ogt, %146, %136 : vector<16x1xf32>
    %148 = arith.maximumf %136, %146 : vector<16x1xf32>
    %cst_70 = arith.constant 6.000000e+01 : f32
    %149 = vector.broadcast %cst_70 : f32 to vector<16x1xf32>
    %150 = arith.select %147, %149, %138 : vector<16x1xi1>, vector<16x1xf32>
    %c65_i32 = arith.constant 65 : i32
    %151 = tpu.dynamic_rotate %12 by %c65_i32 dim 1 : vector<16x128xf32>, i32 -> vector<16x128xf32>
    %c65_i32_71 = arith.constant 65 : i32
    %152 = vector.broadcast %c65_i32_71 : i32 to vector<128x1xi32>
    %153 = arith.cmpi slt, %13, %152 : vector<128x1xi32>
    %cst_72 = arith.constant 1.96923077 : f32
    %cst_73 = arith.constant 0.000000e+00 : f32
    %154 = vector.broadcast %cst_72 : f32 to vector<128x1xf32>
    %155 = vector.broadcast %cst_73 : f32 to vector<128x1xf32>
    %156 = arith.select %153, %154, %155 : vector<128x1xi1>, vector<128x1xf32>
    %157 = arith.mulf %12, %151 : vector<16x128xf32>
    %cst_74 = arith.constant dense<0.000000e+00> : vector<16x1xf32>
    %158 = tpu.matmul %157, %156, %cst_74 {dimension_numbers = #tpu.dot_dimension_numbers<[1], [0], [0], [1], [0, 0, 1, 1], [], []>} : vector<16x128xf32>, vector<128x1xf32>, vector<16x1xf32> -> vector<16x1xf32>
    %159 = arith.cmpf ogt, %158, %148 : vector<16x1xf32>
    %160 = arith.maximumf %148, %158 : vector<16x1xf32>
    %cst_75 = arith.constant 6.300000e+01 : f32
    %161 = vector.broadcast %cst_75 : f32 to vector<16x1xf32>
    %162 = arith.select %159, %161, %150 : vector<16x1xi1>, vector<16x1xf32>
    %c62_i32 = arith.constant 62 : i32
    %163 = tpu.dynamic_rotate %12 by %c62_i32 dim 1 : vector<16x128xf32>, i32 -> vector<16x128xf32>
    %c62_i32_76 = arith.constant 62 : i32
    %164 = vector.broadcast %c62_i32_76 : i32 to vector<128x1xi32>
    %165 = arith.cmpi slt, %13, %164 : vector<128x1xi32>
    %cst_77 = arith.constant 2.06451607 : f32
    %cst_78 = arith.constant 0.000000e+00 : f32
    %166 = vector.broadcast %cst_77 : f32 to vector<128x1xf32>
    %167 = vector.broadcast %cst_78 : f32 to vector<128x1xf32>
    %168 = arith.select %165, %166, %167 : vector<128x1xi1>, vector<128x1xf32>
    %169 = arith.mulf %12, %163 : vector<16x128xf32>
    %cst_79 = arith.constant dense<0.000000e+00> : vector<16x1xf32>
    %170 = tpu.matmul %169, %168, %cst_79 {dimension_numbers = #tpu.dot_dimension_numbers<[1], [0], [0], [1], [0, 0, 1, 1], [], []>} : vector<16x128xf32>, vector<128x1xf32>, vector<16x1xf32> -> vector<16x1xf32>
    %171 = arith.cmpf ogt, %170, %160 : vector<16x1xf32>
    %172 = arith.maximumf %160, %170 : vector<16x1xf32>
    %cst_80 = arith.constant 6.600000e+01 : f32
    %173 = vector.broadcast %cst_80 : f32 to vector<16x1xf32>
    %174 = arith.select %171, %173, %162 : vector<16x1xi1>, vector<16x1xf32>
    %c59_i32 = arith.constant 59 : i32
    %175 = tpu.dynamic_rotate %12 by %c59_i32 dim 1 : vector<16x128xf32>, i32 -> vector<16x128xf32>
    %c59_i32_81 = arith.constant 59 : i32
    %176 = vector.broadcast %c59_i32_81 : i32 to vector<128x1xi32>
    %177 = arith.cmpi slt, %13, %176 : vector<128x1xi32>
    %cst_82 = arith.constant 2.16949153 : f32
    %cst_83 = arith.constant 0.000000e+00 : f32
    %178 = vector.broadcast %cst_82 : f32 to vector<128x1xf32>
    %179 = vector.broadcast %cst_83 : f32 to vector<128x1xf32>
    %180 = arith.select %177, %178, %179 : vector<128x1xi1>, vector<128x1xf32>
    %181 = arith.mulf %12, %175 : vector<16x128xf32>
    %cst_84 = arith.constant dense<0.000000e+00> : vector<16x1xf32>
    %182 = tpu.matmul %181, %180, %cst_84 {dimension_numbers = #tpu.dot_dimension_numbers<[1], [0], [0], [1], [0, 0, 1, 1], [], []>} : vector<16x128xf32>, vector<128x1xf32>, vector<16x1xf32> -> vector<16x1xf32>
    %183 = arith.cmpf ogt, %182, %172 : vector<16x1xf32>
    %184 = arith.maximumf %172, %182 : vector<16x1xf32>
    %cst_85 = arith.constant 6.900000e+01 : f32
    %185 = vector.broadcast %cst_85 : f32 to vector<16x1xf32>
    %186 = arith.select %183, %185, %174 : vector<16x1xi1>, vector<16x1xf32>
    %c56_i32 = arith.constant 56 : i32
    %187 = tpu.dynamic_rotate %12 by %c56_i32 dim 1 : vector<16x128xf32>, i32 -> vector<16x128xf32>
    %c56_i32_86 = arith.constant 56 : i32
    %188 = vector.broadcast %c56_i32_86 : i32 to vector<128x1xi32>
    %189 = arith.cmpi slt, %13, %188 : vector<128x1xi32>
    %cst_87 = arith.constant 2.28571439 : f32
    %cst_88 = arith.constant 0.000000e+00 : f32
    %190 = vector.broadcast %cst_87 : f32 to vector<128x1xf32>
    %191 = vector.broadcast %cst_88 : f32 to vector<128x1xf32>
    %192 = arith.select %189, %190, %191 : vector<128x1xi1>, vector<128x1xf32>
    %193 = arith.mulf %12, %187 : vector<16x128xf32>
    %cst_89 = arith.constant dense<0.000000e+00> : vector<16x1xf32>
    %194 = tpu.matmul %193, %192, %cst_89 {dimension_numbers = #tpu.dot_dimension_numbers<[1], [0], [0], [1], [0, 0, 1, 1], [], []>} : vector<16x128xf32>, vector<128x1xf32>, vector<16x1xf32> -> vector<16x1xf32>
    %195 = arith.cmpf ogt, %194, %184 : vector<16x1xf32>
    %196 = arith.maximumf %184, %194 : vector<16x1xf32>
    %cst_90 = arith.constant 7.200000e+01 : f32
    %197 = vector.broadcast %cst_90 : f32 to vector<16x1xf32>
    %198 = arith.select %195, %197, %186 : vector<16x1xi1>, vector<16x1xf32>
    %c53_i32 = arith.constant 53 : i32
    %199 = tpu.dynamic_rotate %12 by %c53_i32 dim 1 : vector<16x128xf32>, i32 -> vector<16x128xf32>
    %c53_i32_91 = arith.constant 53 : i32
    %200 = vector.broadcast %c53_i32_91 : i32 to vector<128x1xi32>
    %201 = arith.cmpi slt, %13, %200 : vector<128x1xi32>
    %cst_92 = arith.constant 2.41509438 : f32
    %cst_93 = arith.constant 0.000000e+00 : f32
    %202 = vector.broadcast %cst_92 : f32 to vector<128x1xf32>
    %203 = vector.broadcast %cst_93 : f32 to vector<128x1xf32>
    %204 = arith.select %201, %202, %203 : vector<128x1xi1>, vector<128x1xf32>
    %205 = arith.mulf %12, %199 : vector<16x128xf32>
    %cst_94 = arith.constant dense<0.000000e+00> : vector<16x1xf32>
    %206 = tpu.matmul %205, %204, %cst_94 {dimension_numbers = #tpu.dot_dimension_numbers<[1], [0], [0], [1], [0, 0, 1, 1], [], []>} : vector<16x128xf32>, vector<128x1xf32>, vector<16x1xf32> -> vector<16x1xf32>
    %207 = arith.cmpf ogt, %206, %196 : vector<16x1xf32>
    %208 = arith.maximumf %196, %206 : vector<16x1xf32>
    %cst_95 = arith.constant 7.500000e+01 : f32
    %209 = vector.broadcast %cst_95 : f32 to vector<16x1xf32>
    %210 = arith.select %207, %209, %198 : vector<16x1xi1>, vector<16x1xf32>
    %c50_i32 = arith.constant 50 : i32
    %211 = tpu.dynamic_rotate %12 by %c50_i32 dim 1 : vector<16x128xf32>, i32 -> vector<16x128xf32>
    %c50_i32_96 = arith.constant 50 : i32
    %212 = vector.broadcast %c50_i32_96 : i32 to vector<128x1xi32>
    %213 = arith.cmpi slt, %13, %212 : vector<128x1xi32>
    %cst_97 = arith.constant 2.560000e+00 : f32
    %cst_98 = arith.constant 0.000000e+00 : f32
    %214 = vector.broadcast %cst_97 : f32 to vector<128x1xf32>
    %215 = vector.broadcast %cst_98 : f32 to vector<128x1xf32>
    %216 = arith.select %213, %214, %215 : vector<128x1xi1>, vector<128x1xf32>
    %217 = arith.mulf %12, %211 : vector<16x128xf32>
    %cst_99 = arith.constant dense<0.000000e+00> : vector<16x1xf32>
    %218 = tpu.matmul %217, %216, %cst_99 {dimension_numbers = #tpu.dot_dimension_numbers<[1], [0], [0], [1], [0, 0, 1, 1], [], []>} : vector<16x128xf32>, vector<128x1xf32>, vector<16x1xf32> -> vector<16x1xf32>
    %219 = arith.cmpf ogt, %218, %208 : vector<16x1xf32>
    %220 = arith.maximumf %208, %218 : vector<16x1xf32>
    %cst_100 = arith.constant 7.800000e+01 : f32
    %221 = vector.broadcast %cst_100 : f32 to vector<16x1xf32>
    %222 = arith.select %219, %221, %210 : vector<16x1xi1>, vector<16x1xf32>
    %c47_i32 = arith.constant 47 : i32
    %223 = tpu.dynamic_rotate %12 by %c47_i32 dim 1 : vector<16x128xf32>, i32 -> vector<16x128xf32>
    %c47_i32_101 = arith.constant 47 : i32
    %224 = vector.broadcast %c47_i32_101 : i32 to vector<128x1xi32>
    %225 = arith.cmpi slt, %13, %224 : vector<128x1xi32>
    %cst_102 = arith.constant 2.72340417 : f32
    %cst_103 = arith.constant 0.000000e+00 : f32
    %226 = vector.broadcast %cst_102 : f32 to vector<128x1xf32>
    %227 = vector.broadcast %cst_103 : f32 to vector<128x1xf32>
    %228 = arith.select %225, %226, %227 : vector<128x1xi1>, vector<128x1xf32>
    %229 = arith.mulf %12, %223 : vector<16x128xf32>
    %cst_104 = arith.constant dense<0.000000e+00> : vector<16x1xf32>
    %230 = tpu.matmul %229, %228, %cst_104 {dimension_numbers = #tpu.dot_dimension_numbers<[1], [0], [0], [1], [0, 0, 1, 1], [], []>} : vector<16x128xf32>, vector<128x1xf32>, vector<16x1xf32> -> vector<16x1xf32>
    %231 = arith.cmpf ogt, %230, %220 : vector<16x1xf32>
    %232 = arith.maximumf %220, %230 : vector<16x1xf32>
    %cst_105 = arith.constant 8.100000e+01 : f32
    %233 = vector.broadcast %cst_105 : f32 to vector<16x1xf32>
    %234 = arith.select %231, %233, %222 : vector<16x1xi1>, vector<16x1xf32>
    %c44_i32 = arith.constant 44 : i32
    %235 = tpu.dynamic_rotate %12 by %c44_i32 dim 1 : vector<16x128xf32>, i32 -> vector<16x128xf32>
    %c44_i32_106 = arith.constant 44 : i32
    %236 = vector.broadcast %c44_i32_106 : i32 to vector<128x1xi32>
    %237 = arith.cmpi slt, %13, %236 : vector<128x1xi32>
    %cst_107 = arith.constant 2.909091 : f32
    %cst_108 = arith.constant 0.000000e+00 : f32
    %238 = vector.broadcast %cst_107 : f32 to vector<128x1xf32>
    %239 = vector.broadcast %cst_108 : f32 to vector<128x1xf32>
    %240 = arith.select %237, %238, %239 : vector<128x1xi1>, vector<128x1xf32>
    %241 = arith.mulf %12, %235 : vector<16x128xf32>
    %cst_109 = arith.constant dense<0.000000e+00> : vector<16x1xf32>
    %242 = tpu.matmul %241, %240, %cst_109 {dimension_numbers = #tpu.dot_dimension_numbers<[1], [0], [0], [1], [0, 0, 1, 1], [], []>} : vector<16x128xf32>, vector<128x1xf32>, vector<16x1xf32> -> vector<16x1xf32>
    %243 = arith.cmpf ogt, %242, %232 : vector<16x1xf32>
    %244 = arith.maximumf %232, %242 : vector<16x1xf32>
    %cst_110 = arith.constant 8.400000e+01 : f32
    %245 = vector.broadcast %cst_110 : f32 to vector<16x1xf32>
    %246 = arith.select %243, %245, %234 : vector<16x1xi1>, vector<16x1xf32>
    %c41_i32 = arith.constant 41 : i32
    %247 = tpu.dynamic_rotate %12 by %c41_i32 dim 1 : vector<16x128xf32>, i32 -> vector<16x128xf32>
    %c41_i32_111 = arith.constant 41 : i32
    %248 = vector.broadcast %c41_i32_111 : i32 to vector<128x1xi32>
    %249 = arith.cmpi slt, %13, %248 : vector<128x1xi32>
    %cst_112 = arith.constant 3.1219511 : f32
    %cst_113 = arith.constant 0.000000e+00 : f32
    %250 = vector.broadcast %cst_112 : f32 to vector<128x1xf32>
    %251 = vector.broadcast %cst_113 : f32 to vector<128x1xf32>
    %252 = arith.select %249, %250, %251 : vector<128x1xi1>, vector<128x1xf32>
    %253 = arith.mulf %12, %247 : vector<16x128xf32>
    %cst_114 = arith.constant dense<0.000000e+00> : vector<16x1xf32>
    %254 = tpu.matmul %253, %252, %cst_114 {dimension_numbers = #tpu.dot_dimension_numbers<[1], [0], [0], [1], [0, 0, 1, 1], [], []>} : vector<16x128xf32>, vector<128x1xf32>, vector<16x1xf32> -> vector<16x1xf32>
    %255 = arith.cmpf ogt, %254, %244 : vector<16x1xf32>
    %256 = arith.maximumf %244, %254 : vector<16x1xf32>
    %cst_115 = arith.constant 8.700000e+01 : f32
    %257 = vector.broadcast %cst_115 : f32 to vector<16x1xf32>
    %258 = arith.select %255, %257, %246 : vector<16x1xi1>, vector<16x1xf32>
    %c38_i32 = arith.constant 38 : i32
    %259 = tpu.dynamic_rotate %12 by %c38_i32 dim 1 : vector<16x128xf32>, i32 -> vector<16x128xf32>
    %c38_i32_116 = arith.constant 38 : i32
    %260 = vector.broadcast %c38_i32_116 : i32 to vector<128x1xi32>
    %261 = arith.cmpi slt, %13, %260 : vector<128x1xi32>
    %cst_117 = arith.constant 3.36842108 : f32
    %cst_118 = arith.constant 0.000000e+00 : f32
    %262 = vector.broadcast %cst_117 : f32 to vector<128x1xf32>
    %263 = vector.broadcast %cst_118 : f32 to vector<128x1xf32>
    %264 = arith.select %261, %262, %263 : vector<128x1xi1>, vector<128x1xf32>
    %265 = arith.mulf %12, %259 : vector<16x128xf32>
    %cst_119 = arith.constant dense<0.000000e+00> : vector<16x1xf32>
    %266 = tpu.matmul %265, %264, %cst_119 {dimension_numbers = #tpu.dot_dimension_numbers<[1], [0], [0], [1], [0, 0, 1, 1], [], []>} : vector<16x128xf32>, vector<128x1xf32>, vector<16x1xf32> -> vector<16x1xf32>
    %267 = arith.cmpf ogt, %266, %256 : vector<16x1xf32>
    %268 = arith.maximumf %256, %266 : vector<16x1xf32>
    %cst_120 = arith.constant 9.000000e+01 : f32
    %269 = vector.broadcast %cst_120 : f32 to vector<16x1xf32>
    %270 = arith.select %267, %269, %258 : vector<16x1xi1>, vector<16x1xf32>
    %c35_i32 = arith.constant 35 : i32
    %271 = tpu.dynamic_rotate %12 by %c35_i32 dim 1 : vector<16x128xf32>, i32 -> vector<16x128xf32>
    %c35_i32_121 = arith.constant 35 : i32
    %272 = vector.broadcast %c35_i32_121 : i32 to vector<128x1xi32>
    %273 = arith.cmpi slt, %13, %272 : vector<128x1xi32>
    %cst_122 = arith.constant 3.65714288 : f32
    %cst_123 = arith.constant 0.000000e+00 : f32
    %274 = vector.broadcast %cst_122 : f32 to vector<128x1xf32>
    %275 = vector.broadcast %cst_123 : f32 to vector<128x1xf32>
    %276 = arith.select %273, %274, %275 : vector<128x1xi1>, vector<128x1xf32>
    %277 = arith.mulf %12, %271 : vector<16x128xf32>
    %cst_124 = arith.constant dense<0.000000e+00> : vector<16x1xf32>
    %278 = tpu.matmul %277, %276, %cst_124 {dimension_numbers = #tpu.dot_dimension_numbers<[1], [0], [0], [1], [0, 0, 1, 1], [], []>} : vector<16x128xf32>, vector<128x1xf32>, vector<16x1xf32> -> vector<16x1xf32>
    %279 = arith.cmpf ogt, %278, %268 : vector<16x1xf32>
    %280 = arith.maximumf %268, %278 : vector<16x1xf32>
    %cst_125 = arith.constant 9.300000e+01 : f32
    %281 = vector.broadcast %cst_125 : f32 to vector<16x1xf32>
    %282 = arith.select %279, %281, %270 : vector<16x1xi1>, vector<16x1xf32>
    %c32_i32 = arith.constant 32 : i32
    %283 = tpu.dynamic_rotate %12 by %c32_i32 dim 1 : vector<16x128xf32>, i32 -> vector<16x128xf32>
    %c32_i32_126 = arith.constant 32 : i32
    %284 = vector.broadcast %c32_i32_126 : i32 to vector<128x1xi32>
    %285 = arith.cmpi slt, %13, %284 : vector<128x1xi32>
    %cst_127 = arith.constant 4.000000e+00 : f32
    %cst_128 = arith.constant 0.000000e+00 : f32
    %286 = vector.broadcast %cst_127 : f32 to vector<128x1xf32>
    %287 = vector.broadcast %cst_128 : f32 to vector<128x1xf32>
    %288 = arith.select %285, %286, %287 : vector<128x1xi1>, vector<128x1xf32>
    %289 = arith.mulf %12, %283 : vector<16x128xf32>
    %cst_129 = arith.constant dense<0.000000e+00> : vector<16x1xf32>
    %290 = tpu.matmul %289, %288, %cst_129 {dimension_numbers = #tpu.dot_dimension_numbers<[1], [0], [0], [1], [0, 0, 1, 1], [], []>} : vector<16x128xf32>, vector<128x1xf32>, vector<16x1xf32> -> vector<16x1xf32>
    %291 = arith.cmpf ogt, %290, %280 : vector<16x1xf32>
    %292 = arith.maximumf %280, %290 : vector<16x1xf32>
    %cst_130 = arith.constant 9.600000e+01 : f32
    %293 = vector.broadcast %cst_130 : f32 to vector<16x1xf32>
    %294 = arith.select %291, %293, %282 : vector<16x1xi1>, vector<16x1xf32>
    %c29_i32 = arith.constant 29 : i32
    %295 = tpu.dynamic_rotate %12 by %c29_i32 dim 1 : vector<16x128xf32>, i32 -> vector<16x128xf32>
    %c29_i32_131 = arith.constant 29 : i32
    %296 = vector.broadcast %c29_i32_131 : i32 to vector<128x1xi32>
    %297 = arith.cmpi slt, %13, %296 : vector<128x1xi32>
    %cst_132 = arith.constant 4.41379309 : f32
    %cst_133 = arith.constant 0.000000e+00 : f32
    %298 = vector.broadcast %cst_132 : f32 to vector<128x1xf32>
    %299 = vector.broadcast %cst_133 : f32 to vector<128x1xf32>
    %300 = arith.select %297, %298, %299 : vector<128x1xi1>, vector<128x1xf32>
    %301 = arith.mulf %12, %295 : vector<16x128xf32>
    %cst_134 = arith.constant dense<0.000000e+00> : vector<16x1xf32>
    %302 = tpu.matmul %301, %300, %cst_134 {dimension_numbers = #tpu.dot_dimension_numbers<[1], [0], [0], [1], [0, 0, 1, 1], [], []>} : vector<16x128xf32>, vector<128x1xf32>, vector<16x1xf32> -> vector<16x1xf32>
    %303 = arith.cmpf ogt, %302, %292 : vector<16x1xf32>
    %304 = arith.maximumf %292, %302 : vector<16x1xf32>
    %cst_135 = arith.constant 9.900000e+01 : f32
    %305 = vector.broadcast %cst_135 : f32 to vector<16x1xf32>
    %306 = arith.select %303, %305, %294 : vector<16x1xi1>, vector<16x1xf32>
    %c26_i32 = arith.constant 26 : i32
    %307 = tpu.dynamic_rotate %12 by %c26_i32 dim 1 : vector<16x128xf32>, i32 -> vector<16x128xf32>
    %c26_i32_136 = arith.constant 26 : i32
    %308 = vector.broadcast %c26_i32_136 : i32 to vector<128x1xi32>
    %309 = arith.cmpi slt, %13, %308 : vector<128x1xi32>
    %cst_137 = arith.constant 4.92307711 : f32
    %cst_138 = arith.constant 0.000000e+00 : f32
    %310 = vector.broadcast %cst_137 : f32 to vector<128x1xf32>
    %311 = vector.broadcast %cst_138 : f32 to vector<128x1xf32>
    %312 = arith.select %309, %310, %311 : vector<128x1xi1>, vector<128x1xf32>
    %313 = arith.mulf %12, %307 : vector<16x128xf32>
    %cst_139 = arith.constant dense<0.000000e+00> : vector<16x1xf32>
    %314 = tpu.matmul %313, %312, %cst_139 {dimension_numbers = #tpu.dot_dimension_numbers<[1], [0], [0], [1], [0, 0, 1, 1], [], []>} : vector<16x128xf32>, vector<128x1xf32>, vector<16x1xf32> -> vector<16x1xf32>
    %315 = arith.cmpf ogt, %314, %304 : vector<16x1xf32>
    %316 = arith.maximumf %304, %314 : vector<16x1xf32>
    %cst_140 = arith.constant 1.020000e+02 : f32
    %317 = vector.broadcast %cst_140 : f32 to vector<16x1xf32>
    %318 = arith.select %315, %317, %306 : vector<16x1xi1>, vector<16x1xf32>
    %c23_i32 = arith.constant 23 : i32
    %319 = tpu.dynamic_rotate %12 by %c23_i32 dim 1 : vector<16x128xf32>, i32 -> vector<16x128xf32>
    %c23_i32_141 = arith.constant 23 : i32
    %320 = vector.broadcast %c23_i32_141 : i32 to vector<128x1xi32>
    %321 = arith.cmpi slt, %13, %320 : vector<128x1xi32>
    %cst_142 = arith.constant 5.56521749 : f32
    %cst_143 = arith.constant 0.000000e+00 : f32
    %322 = vector.broadcast %cst_142 : f32 to vector<128x1xf32>
    %323 = vector.broadcast %cst_143 : f32 to vector<128x1xf32>
    %324 = arith.select %321, %322, %323 : vector<128x1xi1>, vector<128x1xf32>
    %325 = arith.mulf %12, %319 : vector<16x128xf32>
    %cst_144 = arith.constant dense<0.000000e+00> : vector<16x1xf32>
    %326 = tpu.matmul %325, %324, %cst_144 {dimension_numbers = #tpu.dot_dimension_numbers<[1], [0], [0], [1], [0, 0, 1, 1], [], []>} : vector<16x128xf32>, vector<128x1xf32>, vector<16x1xf32> -> vector<16x1xf32>
    %327 = arith.cmpf ogt, %326, %316 : vector<16x1xf32>
    %328 = arith.maximumf %316, %326 : vector<16x1xf32>
    %cst_145 = arith.constant 1.050000e+02 : f32
    %329 = vector.broadcast %cst_145 : f32 to vector<16x1xf32>
    %330 = arith.select %327, %329, %318 : vector<16x1xi1>, vector<16x1xf32>
    %c20_i32 = arith.constant 20 : i32
    %331 = tpu.dynamic_rotate %12 by %c20_i32 dim 1 : vector<16x128xf32>, i32 -> vector<16x128xf32>
    %c20_i32_146 = arith.constant 20 : i32
    %332 = vector.broadcast %c20_i32_146 : i32 to vector<128x1xi32>
    %333 = arith.cmpi slt, %13, %332 : vector<128x1xi32>
    %cst_147 = arith.constant 6.400000e+00 : f32
    %cst_148 = arith.constant 0.000000e+00 : f32
    %334 = vector.broadcast %cst_147 : f32 to vector<128x1xf32>
    %335 = vector.broadcast %cst_148 : f32 to vector<128x1xf32>
    %336 = arith.select %333, %334, %335 : vector<128x1xi1>, vector<128x1xf32>
    %337 = arith.mulf %12, %331 : vector<16x128xf32>
    %cst_149 = arith.constant dense<0.000000e+00> : vector<16x1xf32>
    %338 = tpu.matmul %337, %336, %cst_149 {dimension_numbers = #tpu.dot_dimension_numbers<[1], [0], [0], [1], [0, 0, 1, 1], [], []>} : vector<16x128xf32>, vector<128x1xf32>, vector<16x1xf32> -> vector<16x1xf32>
    %339 = arith.cmpf ogt, %338, %328 : vector<16x1xf32>
    %340 = arith.maximumf %328, %338 : vector<16x1xf32>
    %cst_150 = arith.constant 1.080000e+02 : f32
    %341 = vector.broadcast %cst_150 : f32 to vector<16x1xf32>
    %342 = arith.select %339, %341, %330 : vector<16x1xi1>, vector<16x1xf32>
    %c17_i32 = arith.constant 17 : i32
    %343 = tpu.dynamic_rotate %12 by %c17_i32 dim 1 : vector<16x128xf32>, i32 -> vector<16x128xf32>
    %c17_i32_151 = arith.constant 17 : i32
    %344 = vector.broadcast %c17_i32_151 : i32 to vector<128x1xi32>
    %345 = arith.cmpi slt, %13, %344 : vector<128x1xi32>
    %cst_152 = arith.constant 7.52941179 : f32
    %cst_153 = arith.constant 0.000000e+00 : f32
    %346 = vector.broadcast %cst_152 : f32 to vector<128x1xf32>
    %347 = vector.broadcast %cst_153 : f32 to vector<128x1xf32>
    %348 = arith.select %345, %346, %347 : vector<128x1xi1>, vector<128x1xf32>
    %349 = arith.mulf %12, %343 : vector<16x128xf32>
    %cst_154 = arith.constant dense<0.000000e+00> : vector<16x1xf32>
    %350 = tpu.matmul %349, %348, %cst_154 {dimension_numbers = #tpu.dot_dimension_numbers<[1], [0], [0], [1], [0, 0, 1, 1], [], []>} : vector<16x128xf32>, vector<128x1xf32>, vector<16x1xf32> -> vector<16x1xf32>
    %351 = arith.cmpf ogt, %350, %340 : vector<16x1xf32>
    %352 = arith.maximumf %340, %350 : vector<16x1xf32>
    %cst_155 = arith.constant 1.110000e+02 : f32
    %353 = vector.broadcast %cst_155 : f32 to vector<16x1xf32>
    %354 = arith.select %351, %353, %342 : vector<16x1xi1>, vector<16x1xf32>
    %cst_156 = arith.constant 9.99999993E-9 : f32
    %355 = vector.broadcast %cst_156 : f32 to vector<16x1xf32>
    %356 = arith.addf %16, %355 : vector<16x1xf32>
    %357 = tpu.reciprocal %356 {approx = true} : vector<16x1xf32> -> vector<16x1xf32>
    %cst_157 = arith.constant 1.600000e+04 : f32
    %358 = vector.broadcast %cst_157 : f32 to vector<16x1xf32>
    %359 = arith.divf %358, %354 : vector<16x1xf32>
    %c0_158 = arith.constant 0 : index
    %c0_159 = arith.constant 0 : index
    %c0_160 = arith.constant 0 : index
    %360 = vector.load %arg3[%c0_158, %c0_159, %c0_160] : memref<1x16x1xf32, #tpu.memory_space<vmem>>, vector<1x16x1xf32>
    %361 = vector.shape_cast %360 : vector<1x16x1xf32> to vector<16x1xf32>
    %362 = vector.shape_cast %359 : vector<16x1xf32> to vector<1x16x1xf32>
    tpu.vector_store %arg3[%c0_158, %c0_159, %c0_160], %362 {strides = array<i32>} : memref<1x16x1xf32, #tpu.memory_space<vmem>>, vector<1x16x1xf32>,
    %363 = arith.mulf %352, %357 : vector<16x1xf32>
    %cst_161 = arith.constant 0.000000e+00 : f32
    %cst_162 = arith.constant 1.000000e+00 : f32
    %364 = vector.broadcast %cst_161 : f32 to vector<16x1xf32>
    %365 = arith.maximumf %364, %363 : vector<16x1xf32>
    %366 = vector.broadcast %cst_162 : f32 to vector<16x1xf32>
    %367 = arith.minimumf %366, %365 : vector<16x1xf32>
    %c0_163 = arith.constant 0 : index
    %c0_164 = arith.constant 0 : index
    %c0_165 = arith.constant 0 : index
    %368 = vector.load %arg4[%c0_163, %c0_164, %c0_165] : memref<1x16x1xf32, #tpu.memory_space<vmem>>, vector<1x16x1xf32>
    %369 = vector.shape_cast %368 : vector<1x16x1xf32> to vector<16x1xf32>
    %370 = vector.shape_cast %367 : vector<16x1xf32> to vector<1x16x1xf32>
    tpu.vector_store %arg4[%c0_163, %c0_164, %c0_165], %370 {strides = array<i32>} : memref<1x16x1xf32, #tpu.memory_space<vmem>>, vector<1x16x1xf32>,
    return
  }
  func.func @transform_0(%arg0: i32, %arg1: i32) -> (i32, i32, i32, i32) {
    %c0_i32 = arith.constant 0 : i32
    %c0_i32_0 = arith.constant 0 : i32
    %c0_i32_1 = arith.constant 0 : i32
    return %arg0, %c0_i32, %arg1, %c0_i32_0 : i32, i32, i32, i32
  }
  func.func @transform_1(%arg0: i32, %arg1: i32) -> (i32, i32, i32) {
    %c0_i32 = arith.constant 0 : i32
    %c0_i32_0 = arith.constant 0 : i32
    return %arg0, %arg1, %c0_i32 : i32, i32, i32
  }
  func.func @transform_2(%arg0: i32, %arg1: i32) -> (i32, i32, i32) {
    %c0_i32 = arith.constant 0 : i32
    %c0_i32_0 = arith.constant 0 : i32
    return %arg0, %arg1, %c0_i32 : i32, i32, i32
  }
}

</mosaic_0001>

<bundles_post_ra>
// kernel: pitch_encoder_forward.1
= control target key start
LH: loop header
LB: loop body
LE: loop exit
PB: predicated region body
PF: predicated region fallthrough
CT: control target
= control target key end

     0   :  { %s2564_s9 = smov 0   ;;  %s2566_s10 = smov 0   ;;  %s2933_s0 = inlined_call_operand.vmem [shape: f32[2,4,16,128], index: 0, kind: input, shape index: {}]   ;;  %s2934_s1 = inlined_call_operand.vmem [shape: f32[2,16,1], index: 1, kind: output, shape index: {0}]   ;;  %s2935_s2 = inlined_call_operand.vmem [shape: f32[2,16,1], index: 2, kind: output, shape index: {1}]  }
   0x1   :  { %s2568_s11 = smov 0  }
   0x2 LB: > { %s25_s12 = sadd.s32 1, %s2485_s10  ;;  %p2324_p0 = scmp.ge.s32.totalorder %s2489_s11, 1  ;;  %s2489_s11 = sphi %s2568_s11, %s13_s11   ;;  %s2485_s10 = sphi %s2566_s10, %s2937_s10   ;;  %s2481_s9 = sphi %s2564_s9, %s2936_s9  }
   0x3   : > { %p27_p1 = scmp.ge.s32.totalorder %s25_s12, 2  ;;  %p138_p2 = scmp.lt.s32.totalorder %s2489_s11, 3 }
   0x5   : > { %s2939_s12 = smov (%p27_p1, %s25_s12), 0  ;;  %p139_p3 = pnand %p2324_p0, %p138_p2 }
   0x6   : > { %p178_p4 = scmp.lt.s32.totalorder (!%p139_p3), %s2481_s9, 1  ;;  %s2491_s17 = smov (!%p139_p3), 95  }
   0x7   : > { %142 = sbr.rel (%p139_p3) target bundleno = 439 (0x1b7), region = 24  ;;  %s2492_s18 = smov (!%p139_p3), 92  }
   0x8   : > { %s2493_s19 = smov (!%p139_p3), 89   ;;  %s2494_s20 = smov (!%p139_p3), 80  }
   0x9   : > { %s2495_s21 = smov (!%p139_p3), 83   ;;  %s2496_s22 = smov (!%p139_p3), 86  }
   0xa   : > { %s2497_s23 = smov (!%p139_p3), 98   ;;  %s2498_s24 = smov (!%p139_p3), 65  }
   0xb   : > { %s2499_s25 = smov (!%p139_p3), 68   ;;  %s2500_s26 = smov (!%p139_p3), 74  }
   0xc   : > { %s2941_s9 = smov (!%p178_p4, %s2481_s9), 1  ;;  %s2501_s27 = smov 77   ;;  %v226_v16 = vlaneseq  ;;  %v2504_v19 = vmov 1.3913044   ;;  %v2505_v20 = vmov 1.3473685  }
   0xd   : > { %s2364_s13 = sshll.u32 %s2941_s9, 6  ;;  %s2502_s28 = smov 56   ;;  %v2506_v21 = vmov 1.4382023   ;;  %v2512_v24 = vmov 1.5421686  }
   0xe   : > { %s185_s16 = scalar_lea.vmem %s2933_s0, %s2364_s13  ;;  %v2613_v17 = vshrl.u32 %v226_v16, 7  ;;  %s2503_s29 = smov 53   ;;  %v2513_v25 = vmov 1.3061224   ;;  %v2514_v26 = vmov 1.4883721  }
   0xf   : > { %v207_v0 = vld [vmem:[%s185_s16] sm:$0xff]  ;;  %v2331_v1 = vld [vmem:[%s185_s16 + $0x10] sm:$0xff]  ;;  %v208_v4 = vld [vmem:[%s185_s16 + $0x8] sm:$0xff]  ;;  %s2507_s30 = smov 71   ;;  %s2508_s3 = smov 62  }
  0x10   : > { %v2333_v2 = vld [vmem:[%s185_s16 + $0x20] sm:$0xff]  ;;  %v212_v3 = vadd.f32 %v2331_v1, %v207_v0  ;;  %v2332_v5 = vld [vmem:[%s185_s16 + $0x18] sm:$0xff]  ;;  %v2335_v6 = vld [vmem:[%s185_s16 + $0x30] sm:$0xff]  ;;  %v238_v18 = vadd.s32 88, %v2613_v17  ;;  %v237_v22 = vadd.s32 80, %v2613_v17  ;;  %v239_v23 = vadd.s32 96, %v2613_v17 }
  0x11   : > { %v213_v7 = vadd.f32 %v2332_v5, %v208_v4  ;;  %v2334_v8 = vld [vmem:[%s185_s16 + $0x28] sm:$0xff]  ;;  %v2336_v10 = vld [vmem:[%s185_s16 + $0x38] sm:$0xff]  ;;  %s2509_s4 = smov 41   ;;  %s2510_s5 = smov 44   ;;  %v2516_v27 = vmov 1.6  }
  0x12   : > { %v217_v9 = vadd.f32 %v2333_v2, %v212_v3  ;;  %vm390_vm0 = vcmp.lt.s32.totalorder %v238_v18, 92  ;;  %vm323_vm1 = vcmp.lt.s32.totalorder %v238_v18, 95  ;;  %vm457_vm2 = vcmp.lt.s32.totalorder %v238_v18, 89  ;;  %s2511_s6 = smov 59   ;;  %s2515_s7 = smov 50  }
  0x13   : > { %v218_v11 = vadd.f32 %v2334_v8, %v213_v7  ;;  %2339 = vmatpush.msk.msra.mxu2 %vm390_vm0, %v2504_v19  ;;  %2338 = vmatpush.msk.msra.mxu1 %vm323_vm1, %v2505_v20  ;;  %vm590_vm3 = vcmp.lt.s32.totalorder %v237_v22, 83  ;;  %vm261_vm4 = vcmp.lt.s32.totalorder %v239_v23, 98  ;;  %vm523_vm5 = vcmp.lt.s32.totalorder %v237_v22, 86  ;;  %s2517_s8 = smov 38   ;;  %s2518_s13 = smov 47  }
  0x14   : > { %v222_v12 = vadd.f32 %v2335_v6, %v217_v9  ;;  %2340 = vmatpush.msk.msra.mxu3 %vm457_vm2, %v2506_v21  ;;  %2337 = vmatpush.msk.msra.mxu0 %vm261_vm4, %v2513_v25  ;;  %s2519_s14 = smov 35   ;;  %v236_v31 = vadd.s32 72, %v2613_v17  ;;  %v2673_v32 = vadd.s32 64, %v2613_v17  ;;  %s2520_s15 = smov 29   ;;  %v2522_v35 = vmov 1.6623377  }
  0x15   : > { %v223_v13 = vadd.f32 %v2336_v10, %v218_v11  ;;  %418 = vmatpush.msra.mxu2 %v2504_v19  ;;  %351 = vmatpush.msra.mxu1 %v2505_v20  ;;  %s2521_s16 = smov 32   ;;  %v2523_v39 = vmov 1.9692308   ;;  %v2524_v40 = vmov 1.882353   ;;  %v2745_v60 = vadd.s32 56, %v2613_v17 }
  0x16   : > { %v2588_v14 = vmul.f32 0.25, %v222_v12  ;;  %485 = vmatpush.msra.mxu3 %v2506_v21  ;;  %287 = vmatpush.msra.mxu0 %v2513_v25  ;;  %vm723_vm6 = vcmp.lt.s32.totalorder %v236_v31, 77  ;;  %vm990_vm7 = vcmp.lt.s32.totalorder %v2673_v32, 65  ;;  %vm923_vm8 = vcmp.lt.s32.totalorder %v2673_v32, 68 }
  0x17   : > { %v2590_v15 = vmul.f32 0.25, %v223_v13  ;;  %419 = vmatpush.msra.mxu2 %v2504_v19  ;;  %352 = vmatpush.msra.mxu1 %v2505_v20  ;;  %vm790_vm9 = vcmp.lt.s32.totalorder %v236_v31, 74  ;;  %v2525_v47 = vmov 1.7297298   ;;  %v2530_v61 = vmov 2.2857144  }
  0x18   : > { %308 = vrot.lane.b32.xlu1 %v2588_v14, %s2491_s17  ;;  %375 = vrot.lane.b32.xlu0 %v2588_v14, %s2492_s18  ;;  %vm856_vm10 = vcmp.lt.s32.totalorder %v2673_v32, 71  ;;  %vm1056_vm11 = vcmp.lt.s32.totalorder %v2745_v60, 62  ;;  %v2756_v62 = vadd.s32 48, %v2613_v17  ;;  %v2531_v2 = vmov 1.8028169  }
  0x19   : > { %444 = vrot.lane.b32.xlu2 %v2590_v15, %s2493_s19  ;;  %486 = vmatpush.msra.mxu3 %v2506_v21  ;;  %v2532_v5 = vmov 2.064516   ;;  %v2533_v8 = vmov 2.4150944   ;;  %v2781_v16 = vadd.s32 40, %v2613_v17  ;;  %vm1123_vm14 = vcmp.lt.s32.totalorder %v2745_v60, 59 }
  0x1a   : > { %420 = vmatpush.msra.mxu2 %v2504_v19  ;;  %353 = vmatpush.msra.mxu1 %v2505_v20  ;;  %vm1256_vm12 = vcmp.lt.s32.totalorder %v2756_v62, 53  ;;  %vm1323_vm0 = vcmp.lt.s32.totalorder %v2756_v62, 50 }
  0x1b   : > { %487 = vmatpush.msra.mxu3 %v2506_v21  ;;  %288 = vmatpush.msra.mxu0 %v2513_v25  ;;  %vm1456_vm13 = vcmp.lt.s32.totalorder %v2781_v16, 44  ;;  %vm1523_vm15 = vcmp.lt.s32.totalorder %v2781_v16, 41  ;;  %vm1389_vm2 = vcmp.lt.s32.totalorder %v2781_v16, 47  ;;  %v2545_v16 = vmov 7.529412  }
  0x1c   : > { %421 = vmatpush.msra.mxu2 %v2504_v19  ;;  %354 = vmatpush.msra.mxu1 %v2505_v20 }
  0x1d   : > { %488 = vmatpush.msra.mxu3 %v2506_v21  ;;  %289 = vmatpush.msra.mxu0 %v2513_v25 }
  0x1e   : > { %422 = vmatpush.msra.mxu2 %v2504_v19  ;;  %355 = vmatpush.msra.mxu1 %v2505_v20 }
  0x1f   : > { %489 = vmatpush.msra.mxu3 %v2506_v21  ;;  %290 = vmatpush.msra.mxu0 %v2513_v25 }
  0x20   : > { %377 = vrot.lane.b32.xlu1 %v2590_v15, %s2492_s18  ;;  %442 = vrot.lane.b32.xlu0 %v2588_v14, %s2493_s19  ;;  %s2527_s18 = smov 26   ;;  %s2528_s19 = smov 23  }
  0x21   : > { %310 = vrot.lane.b32.xlu2 %v2590_v15, %s2491_s17  ;;  %423 = vmatpush.msra.mxu2 %v2504_v19  ;;  %s2526_s17 = smov 20  }
  0x22   : > { %356 = vmatpush.msra.mxu1 %v2505_v20  ;;  %490 = vmatpush.msra.mxu3 %v2506_v21 }
  0x23   : > { %424 = vmatpush.msra.mxu2 %v2504_v19  ;;  %291 = vmatpush.msra.mxu0 %v2513_v25 }
  0x24   : > { %357 = vmatpush.msra.mxu1 %v2505_v20  ;;  %491 = vmatpush.msra.mxu3 %v2506_v21 }
  0x25   : > { %425 = vmatpush.msra.mxu2 %v2504_v19  ;;  %292 = vmatpush.msra.mxu0 %v2513_v25 }
  0x26   : > { %358 = vmatpush.msra.mxu1 %v2505_v20  ;;  %492 = vmatpush.msra.mxu3 %v2506_v21 }
  0x27   : > { %426 = vmatpush.msra.mxu2 %v2504_v19  ;;  %293 = vmatpush.msra.mxu0 %v2513_v25 }
  0x28   : > { %643 = vrot.lane.b32.xlu1 %v2588_v14, %s2494_s20  ;;  %576 = vrot.lane.b32.xlu0 %v2588_v14, %s2495_s21 }
  0x29   : > { %509 = vrot.lane.b32.xlu2 %v2588_v14, %s2496_s22  ;;  %427 = vmatpush.msra.mxu2 %v2504_v19 }
  0x2a   : > { %359 = vmatpush.msra.mxu1 %v2505_v20  ;;  %493 = vmatpush.msra.mxu3 %v2506_v21 }
  0x2b   : > { %428 = vmatpush.msra.mxu2 %v2504_v19  ;;  %294 = vmatpush.msra.mxu0 %v2513_v25 }
  0x2c   : > { %360 = vmatpush.msra.mxu1 %v2505_v20  ;;  %494 = vmatpush.msra.mxu3 %v2506_v21 }
  0x2d   : > { %2342 = vmatpush.msk.msrb.mxu2 %vm590_vm3, %v2512_v24  ;;  %295 = vmatpush.msra.mxu0 %v2513_v25 }
  0x2e   : > { %361 = vmatpush.msra.mxu1 %v2505_v20  ;;  %495 = vmatpush.msra.mxu3 %v2506_v21 }
  0x2f   : > { %620 = vmatpush.msrb.mxu2 %v2512_v24  ;;  %296 = vmatpush.msra.mxu0 %v2513_v25 }
  0x30   : > { %578 = vrot.lane.b32.xlu1 %v2590_v15, %s2495_s21  ;;  %245 = vrot.lane.b32.xlu0 %v2588_v14, %s2497_s23  ;;  %s2365_s21 = sshll.u32 %s2941_s9, 4 }
  0x31   : > { %645 = vrot.lane.b32.xlu2 %v2590_v15, %s2494_s20  ;;  %621 = vmatpush.msrb.mxu2 %v2512_v24  ;;  %s2529_s20 = smov 17   ;;  %s195_s9 = scalar_lea.vmem %s2934_s1, %s2365_s21 }
  0x32   : > { %2341 = vmatpush.msk.msrb.mxu1 %vm523_vm5, %v2514_v26  ;;  %687 = vmatpush.msrb.mxu3 %v2516_v27 }
  0x33   : > { %622 = vmatpush.msrb.mxu2 %v2512_v24  ;;  %297 = vmatpush.msra.mxu0 %v2513_v25 }
  0x34   : > { %553 = vmatpush.msrb.mxu1 %v2514_v26  ;;  %688 = vmatpush.msrb.mxu3 %v2516_v27 }
  0x35   : > { %623 = vmatpush.msrb.mxu2 %v2512_v24  ;;  %298 = vmatpush.msra.mxu0 %v2513_v25  ;;  %v2535_v25 = vmov 2.1694915  }
  0x36   : > { %554 = vmatpush.msrb.mxu1 %v2514_v26  ;;  %689 = vmatpush.msrb.mxu3 %v2516_v27 }
  0x37   : > { %624 = vmatpush.msrb.mxu2 %v2512_v24  ;;  %2343 = vmatpush.msk.msrb.mxu0 %vm723_vm6, %v2522_v35 }
  0x38   : > { %247 = vrot.lane.b32.xlu1 %v2590_v15, %s2497_s23  ;;  %511 = vrot.lane.b32.xlu0 %v2590_v15, %s2496_s22 }
  0x39   : > { %978 = vrot.lane.b32.xlu2 %v2588_v14, %s2498_s24  ;;  %555 = vmatpush.msrb.mxu1 %v2514_v26 }
  0x3a   : > { %625 = vmatpush.msrb.mxu2 %v2512_v24  ;;  %690 = vmatpush.msrb.mxu3 %v2516_v27 }
  0x3b   : > { %556 = vmatpush.msrb.mxu1 %v2514_v26  ;;  %755 = vmatpush.msrb.mxu0 %v2522_v35 }
  0x3c   : > { %626 = vmatpush.msrb.mxu2 %v2512_v24  ;;  %691 = vmatpush.msrb.mxu3 %v2516_v27 }
  0x3d   : > { %557 = vmatpush.msrb.mxu1 %v2514_v26  ;;  %756 = vmatpush.msrb.mxu0 %v2522_v35 }
  0x3e   : > { %627 = vmatpush.msrb.mxu2 %v2512_v24  ;;  %692 = vmatpush.msrb.mxu3 %v2516_v27 }
  0x3f   : > { %558 = vmatpush.msrb.mxu1 %v2514_v26  ;;  %757 = vmatpush.msrb.mxu0 %v2522_v35 }
  0x40   : > { %911 = vrot.lane.b32.xlu1 %v2588_v14, %s2499_s25  ;;  %777 = vrot.lane.b32.xlu0 %v2588_v14, %s2500_s26 }
  0x41   : > { %710 = vrot.lane.b32.xlu2 %v2588_v14, %s2501_s27  ;;  %628 = vmatpush.msrb.mxu2 %v2512_v24 }
  0x42   : > { %693 = vmatpush.msrb.mxu3 %v2516_v27  ;;  %559 = vmatpush.msrb.mxu1 %v2514_v26 }
  0x43   : > { %629 = vmatpush.msrb.mxu2 %v2512_v24  ;;  %758 = vmatpush.msrb.mxu0 %v2522_v35  ;;  %v2534_v24 = vmov 2.909091  }
  0x44   : > { %694 = vmatpush.msrb.mxu3 %v2516_v27  ;;  %560 = vmatpush.msrb.mxu1 %v2514_v26 }
  0x45   : > { %759 = vmatpush.msrb.mxu0 %v2522_v35 }
  0x46   : > { %695 = vmatpush.msrb.mxu3 %v2516_v27  ;;  %561 = vmatpush.msrb.mxu1 %v2514_v26 }
  0x47   : > { %760 = vmatpush.msrb.mxu0 %v2522_v35 }
  0x48   : > { %779 = vrot.lane.b32.xlu1 %v2590_v15, %s2500_s26  ;;  %980 = vrot.lane.b32.xlu0 %v2590_v15, %s2498_s24  ;;  %s205_s24 = scalar_lea.vmem %s2935_s2, %s2365_s21 }
  0x49   : > { %913 = vrot.lane.b32.xlu2 %v2590_v15, %s2499_s25  ;;  %696 = vmatpush.msrb.mxu3 %v2516_v27  ;;  %v2536_v27 = vmov 3.121951  }
  0x4a   : > { %562 = vmatpush.msrb.mxu1 %v2514_v26  ;;  %761 = vmatpush.msrb.mxu0 %v2522_v35 }
  0x4c   : > { %762 = vmatpush.msrb.mxu0 %v2522_v35 }
  0x4e   : > { %763 = vmatpush.msrb.mxu0 %v2522_v35 }
  0x50   : > { %1179 = vrot.lane.b32.xlu1 %v2588_v14, %s2502_s28  ;;  %712 = vrot.lane.b32.xlu0 %v2590_v15, %s2501_s27 }
  0x51   : > { %1246 = vrot.lane.b32.xlu2 %v2588_v14, %s2503_s29 }
  0x58   : > { %844 = vrot.lane.b32.xlu1 %v2588_v14, %s2507_s30  ;;  %1045 = vrot.lane.b32.xlu0 %v2588_v14, %s2508_s3 }
  0x59   : > { %1181 = vrot.lane.b32.xlu2 %v2590_v15, %s2502_s28 }
  0x60   : > { %1047 = vrot.lane.b32.xlu1 %v2590_v15, %s2508_s3  ;;  %1248 = vrot.lane.b32.xlu0 %v2590_v15, %s2503_s29 }
  0x61   : > { %846 = vrot.lane.b32.xlu2 %v2590_v15, %s2507_s30 }
  0x68   : > { %1514 = vrot.lane.b32.xlu1 %v2588_v14, %s2509_s4  ;;  %1447 = vrot.lane.b32.xlu0 %v2588_v14, %s2510_s5 }
  0x69   : > { %1112 = vrot.lane.b32.xlu2 %v2588_v14, %s2511_s6 }
  0x70   : > { %1449 = vrot.lane.b32.xlu1 %v2590_v15, %s2510_s5  ;;  %1313 = vrot.lane.b32.xlu0 %v2588_v14, %s2515_s7 }
  0x71   : > { %1516 = vrot.lane.b32.xlu2 %v2590_v15, %s2509_s4 }
  0x73   : > { %v2641_v28 = vpop.permute.xlu2 %444 }
  0x74   : > { %v479_v51 = vmul.f32 %v2641_v28, %v2590_v15  ;;  %v2537_v28 = vmov 2.56  }
  0x78   : > { %1315 = vrot.lane.b32.xlu1 %v2590_v15, %s2515_s7  ;;  %1114 = vrot.lane.b32.xlu0 %v2590_v15, %s2511_s6 }
  0x79   : > { %1583 = vrot.lane.b32.xlu2 %v2590_v15, %s2517_s8 }
  0x7b   : > { %v311_v29 = vpop.permute.xlu2 %310 }
  0x7c   : > { %v345_v41 = vmul.f32 %v311_v29, %v2590_v15 }
  0x80   : > { %1380 = vrot.lane.b32.xlu1 %v2588_v14, %s2518_s13  ;;  %1650 = vrot.lane.b32.xlu0 %v2590_v15, %s2519_s14 }
  0x81   : > { %1581 = vrot.lane.b32.xlu2 %v2588_v14, %s2517_s8 }
  0x83   : > { %v2664_v30 = vpop.permute.xlu2 %509 }
  0x84   : > { %v545_v48 = vmul.f32 %v2664_v30, %v2588_v14 }
  0x88   : > { %1782 = vrot.lane.b32.xlu1 %v2588_v14, %s2520_s15  ;;  %1715 = vrot.lane.b32.xlu0 %v2588_v14, %s2521_s16 }
  0x89   : > { %1382 = vrot.lane.b32.xlu2 %v2590_v15, %s2518_s13 }
  0x8a   : > { %v309_v33 = vpop.permute.xlu1 %308  ;;  %v376_v34 = vpop.permute.xlu0 %375 }
  0x8b   : > { %v344_v36 = vmul.f32 %v309_v33, %v2588_v14  ;;  %v411_v37 = vmul.f32 %v376_v34, %v2588_v14  ;;  %v2682_v38 = vpop.permute.xlu2 %645  ;;  %v2800_v34 = vadd.s32 32, %v2613_v17 }
  0x8c   : > { %v680_v6 = vmul.f32 %v2682_v38, %v2590_v15 }
  0x8d   : > { %429 = vmatmul.f32.vlgmr.msra.gmra.mxu2 %v411_v37  ;;  %362 = vmatmul.f32.vlgmr.msra.gmra.mxu1 %v344_v36  ;;  %vm1589_vm1 = vcmp.lt.s32.totalorder %v2800_v34, 38  ;;  %vm1656_vm3 = vcmp.lt.s32.totalorder %v2800_v34, 35 }
  0x8e   : > { %2347 = vmatpush.msk.msra.mxu2 %vm990_vm7, %v2523_v39  ;;  %2346 = vmatpush.msk.msra.mxu1 %vm923_vm8, %v2524_v40 }
  0x90   : > { %1784 = vrot.lane.b32.xlu1 %v2590_v15, %s2520_s15  ;;  %1717 = vrot.lane.b32.xlu0 %v2590_v15, %s2521_s16 }
  0x91   : > { %1024 = vmatpush.msra.mxu2 %v2523_v39  ;;  %1648 = vrot.lane.b32.xlu2 %v2588_v14, %s2519_s14 }
  0x92   : > { %v378_v42 = vpop.permute.xlu1 %377  ;;  %v443_v43 = vpop.permute.xlu0 %442  ;;  %957 = vmatpush.msra.mxu1 %v2524_v40 }
  0x93   : > { %v412_v44 = vmul.f32 %v378_v42, %v2590_v15  ;;  %v478_v45 = vmul.f32 %v443_v43, %v2588_v14  ;;  %1025 = vmatpush.msra.mxu2 %v2523_v39  ;;  %v2702_v46 = vpop.permute.xlu2 %978  ;;  %v2539_v42 = vmov 2.7234042  }
  0x94   : > { %958 = vmatpush.msra.mxu1 %v2524_v40  ;;  %v1014_v63 = vmul.f32 %v2702_v46, %v2588_v14 }
  0x95   : > { %432 = vmatmul.f32.gmra.mxu2 %v412_v44  ;;  %496 = vmatmul.f32.vlgmr.msra.gmra.mxu3 %v478_v45  ;;  %v2540_v44 = vmov 3.6571429  }
  0x96   : > { %365 = vmatmul.f32.gmra.mxu1 %v345_v41  ;;  %2344 = vmatpush.msk.msra.mxu3 %vm790_vm9, %v2525_v47  ;;  %v2538_v41 = vmov 3.368421  }
  0x97   : > { %1026 = vmatpush.msra.mxu2 %v2523_v39  ;;  %959 = vmatpush.msra.mxu1 %v2524_v40 }
  0x98   : > { %1983 = vrot.lane.b32.xlu1 %v2588_v14, %s2526_s17  ;;  %1849 = vrot.lane.b32.xlu0 %v2588_v14, %s2527_s18 }
  0x99   : > { %822 = vmatpush.msra.mxu3 %v2525_v47  ;;  %1027 = vmatpush.msra.mxu2 %v2523_v39 }
  0x9a   : > { %v644_v49 = vpop.permute.xlu1 %643  ;;  %v577_v50 = vpop.permute.xlu0 %576  ;;  %960 = vmatpush.msra.mxu1 %v2524_v40  ;;  %2050 = vrot.lane.b32.xlu2 %v2588_v14, %s2529_s20 }
  0x9b   : > { %v612_v52 = vmul.f32 %v577_v50, %v2588_v14  ;;  %823 = vmatpush.msra.mxu3 %v2525_v47  ;;  %1028 = vmatpush.msra.mxu2 %v2523_v39  ;;  %v2722_v53 = vpop.permute.xlu2 %710  ;;  %v679_v56 = vmul.f32 %v644_v49, %v2588_v14  ;;  %v230_v50 = vadd.s32 24, %v2613_v17 }
  0x9c   : > { %961 = vmatpush.msra.mxu1 %v2524_v40  ;;  %v746_v9 = vmul.f32 %v2722_v53, %v2588_v14 }
  0x9d   : > { %499 = vmatmul.f32.gmra.mxu3 %v479_v51  ;;  %630 = vmatmul.f32.vlgmr.msrb.gmra.mxu2 %v612_v52  ;;  %vm1789_vm4 = vcmp.lt.s32.totalorder %v230_v50, 29  ;;  %vm1856_vm5 = vcmp.lt.s32.totalorder %v230_v50, 26 }
  0x9e   : > { %563 = vmatmul.f32.vlgmr.msrb.gmra.mxu1 %v545_v48  ;;  %824 = vmatpush.msra.mxu3 %v2525_v47 }
  0x9f   : > { %1029 = vmatpush.msra.mxu2 %v2523_v39  ;;  %962 = vmatpush.msra.mxu1 %v2524_v40 }
  0xa0   : > { %1851 = vrot.lane.b32.xlu1 %v2590_v15, %s2527_s18  ;;  %1916 = vrot.lane.b32.xlu0 %v2588_v14, %s2528_s19 }
  0xa1   : > { %825 = vmatpush.msra.mxu3 %v2525_v47  ;;  %1030 = vmatpush.msra.mxu2 %v2523_v39 }
  0xa2   : > { %v579_v54 = vpop.permute.xlu1 %578  ;;  %v246_v55 = vpop.permute.xlu0 %245  ;;  %963 = vmatpush.msra.mxu1 %v2524_v40  ;;  %1985 = vrot.lane.b32.xlu2 %v2590_v15, %s2526_s17 }
  0xa3   : > { %v613_v57 = vmul.f32 %v579_v54, %v2590_v15  ;;  %v281_v58 = vmul.f32 %v246_v55, %v2588_v14  ;;  %826 = vmatpush.msra.mxu3 %v2525_v47  ;;  %1031 = vmatpush.msra.mxu2 %v2523_v39  ;;  %v2740_v59 = vpop.permute.xlu2 %913 }
  0xa4   : > { %964 = vmatpush.msra.mxu1 %v2524_v40  ;;  %v948_v19 = vmul.f32 %v2740_v59, %v2590_v15 }
  0xa5   : > { %299 = vmatmul.f32.vlgmr.msra.gmra.mxu0 %v281_v58  ;;  %697 = vmatmul.f32.vlgmr.msrb.gmra.mxu3 %v679_v56  ;;  %v2541_v56 = vmov 4.0   ;;  %v2542_v58 = vmov 4.413793  }
  0xa6   : > { %633 = vmatmul.f32.gmra.mxu2 %v613_v57  ;;  %827 = vmatpush.msra.mxu3 %v2525_v47 }
  0xa7   : > { %1226 = vmatpush.msrb.mxu2 %v2530_v61  ;;  %2345 = vmatpush.msk.msra.mxu0 %vm856_vm10, %v2531_v2 }
  0xa8   : > { %1918 = vrot.lane.b32.xlu1 %v2590_v15, %s2528_s19  ;;  %2052 = vrot.lane.b32.xlu0 %v2590_v15, %s2529_s20 }
  0xa9   : > { %828 = vmatpush.msra.mxu3 %v2525_v47  ;;  %1227 = vmatpush.msrb.mxu2 %v2530_v61 }
  0xaa   : > { %v248_v0 = vpop.permute.xlu1 %247  ;;  %v512_v1 = vpop.permute.xlu0 %511  ;;  %2348 = vmatpush.msk.msrb.mxu1 %vm1056_vm11, %v2532_v5  ;;  %890 = vmatpush.msra.mxu0 %v2531_v2 }
  0xab   : > { %v282_v3 = vmul.f32 %v248_v0, %v2590_v15  ;;  %v546_v4 = vmul.f32 %v512_v1, %v2590_v15  ;;  %829 = vmatpush.msra.mxu3 %v2525_v47  ;;  %v2770_v7 = vpop.permute.xlu2 %1246  ;;  %1228 = vmatpush.msrb.mxu2 %v2530_v61  ;;  %v2543_v0 = vmov 4.923077   ;;  %v229_v1 = vadd.s32 16, %v2613_v17 }
  0xac   : > { %891 = vmatpush.msra.mxu0 %v2531_v2  ;;  %1092 = vmatpush.msrb.mxu1 %v2532_v5  ;;  %v1282_v29 = vmul.f32 %v2770_v7, %v2588_v14 }
  0xad   : > { %302 = vmatmul.f32.gmra.mxu0 %v282_v3  ;;  %566 = vmatmul.f32.gmra.mxu1 %v546_v4  ;;  %vm1989_vm6 = vcmp.lt.s32.totalorder %v229_v1, 20  ;;  %vm2056_vm7 = vcmp.lt.s32.totalorder %v229_v1, 17  ;;  %vm1922_vm8 = vcmp.lt.s32.totalorder %v229_v1, 23 }
  0xae   : > { %700 = vmatmul.f32.gmra.mxu3 %v680_v6  ;;  %1032 = vmatmul.f32.vlgmr.msra.gmra.mxu2 %v1014_v63 }
  0xaf   : > { %830 = vmatpush.msra.mxu3 %v2525_v47  ;;  %1229 = vmatpush.msrb.mxu2 %v2530_v61 }
  0xb0   : > { %892 = vmatpush.msra.mxu0 %v2531_v2  ;;  %1093 = vmatpush.msrb.mxu1 %v2532_v5 }
  0xb1   : > { %2350 = vmatpush.msk.msrb.mxu3 %vm1256_vm12, %v2533_v8  ;;  %1230 = vmatpush.msrb.mxu2 %v2530_v61 }
  0xb2   : > { %v912_v10 = vpop.permute.xlu1 %911  ;;  %v778_v11 = vpop.permute.xlu0 %777  ;;  %893 = vmatpush.msra.mxu0 %v2531_v2  ;;  %1094 = vmatpush.msrb.mxu1 %v2532_v5 }
  0xb3   : > { %1294 = vmatpush.msrb.mxu3 %v2533_v8  ;;  %v947_v12 = vmul.f32 %v912_v10, %v2588_v14  ;;  %v813_v13 = vmul.f32 %v778_v11, %v2588_v14  ;;  %1231 = vmatpush.msrb.mxu2 %v2530_v61  ;;  %v1182_v18 = vpop.permute.xlu2 %1181 }
  0xb4   : > { %894 = vmatpush.msra.mxu0 %v2531_v2  ;;  %1095 = vmatpush.msrb.mxu1 %v2532_v5  ;;  %v1216_v35 = vmul.f32 %v1182_v18, %v2590_v15  ;;  %v2546_v18 = vmov 1.0  }
  0xb5   : > { %1295 = vmatpush.msrb.mxu3 %v2533_v8  ;;  %764 = vmatmul.f32.vlgmr.msrb.gmra.mxu0 %v746_v9 }
  0xb6   : > { %965 = vmatmul.f32.vlgmr.msra.gmra.mxu1 %v947_v12  ;;  %831 = vmatmul.f32.vlgmr.msra.gmra.mxu3 %v813_v13 }
  0xb7   : > { %1296 = vmatpush.msrb.mxu3 %v2533_v8  ;;  %1232 = vmatpush.msrb.mxu2 %v2530_v61 }
  0xb8   : > { %895 = vmatpush.msra.mxu0 %v2531_v2  ;;  %1096 = vmatpush.msrb.mxu1 %v2532_v5 }
  0xb9   : > { %1297 = vmatpush.msrb.mxu3 %v2533_v8  ;;  %2353 = vmatpush.msk.msra.mxu2 %vm1456_vm13, %v2534_v24 }
  0xba   : > { %v780_v20 = vpop.permute.xlu1 %779  ;;  %v981_v21 = vpop.permute.xlu0 %980  ;;  %1097 = vmatpush.msrb.mxu1 %v2532_v5  ;;  %896 = vmatpush.msra.mxu0 %v2531_v2 }
  0xbb   : > { %v814_v22 = vmul.f32 %v780_v20, %v2590_v15  ;;  %v1015_v23 = vmul.f32 %v981_v21, %v2590_v15  ;;  %1298 = vmatpush.msrb.mxu3 %v2533_v8  ;;  %1496 = vmatpush.msra.mxu2 %v2534_v24  ;;  %v847_v26 = vpop.permute.xlu2 %846 }
  0xbc   : > { %897 = vmatpush.msra.mxu0 %v2531_v2  ;;  %1098 = vmatpush.msrb.mxu1 %v2532_v5  ;;  %v881_v43 = vmul.f32 %v847_v26, %v2590_v15 }
  0xbd   : > { %1035 = vmatmul.f32.gmra.mxu2 %v1015_v23  ;;  %1299 = vmatpush.msrb.mxu3 %v2533_v8  ;;  %v2544_v8 = vmov 6.4  }
  0xbe   : > { %968 = vmatmul.f32.gmra.mxu1 %v948_v19  ;;  %834 = vmatmul.f32.gmra.mxu3 %v814_v22  ;;  %v2547_v19 = vmov 5.5652175  }
  0xbf   : > { %2349 = vmatpush.msk.msra.mxu1 %vm1123_vm14, %v2535_v25  ;;  %2354 = vmatpush.msk.msra.mxu3 %vm1523_vm15, %v2536_v27 }
  0xc0   : > { %2351 = vmatpush.msk.msrb.mxu0 %vm1323_vm0, %v2537_v28  ;;  %1497 = vmatpush.msra.mxu2 %v2534_v24 }
  0xc1   : > { %1159 = vmatpush.msra.mxu1 %v2535_v25  ;;  %1563 = vmatpush.msra.mxu3 %v2536_v27 }
  0xc2   : > { %v1180_v30 = vpop.permute.xlu1 %1179  ;;  %v713_v31 = vpop.permute.xlu0 %712  ;;  %1361 = vmatpush.msrb.mxu0 %v2537_v28  ;;  %1498 = vmatpush.msra.mxu2 %v2534_v24 }
  0xc3   : > { %v1215_v32 = vmul.f32 %v1180_v30, %v2588_v14  ;;  %v747_v33 = vmul.f32 %v713_v31, %v2590_v15  ;;  %1160 = vmatpush.msra.mxu1 %v2535_v25  ;;  %1564 = vmatpush.msra.mxu3 %v2536_v27  ;;  %v1113_v40 = vpop.permute.xlu2 %1112 }
  0xc4   : > { %1499 = vmatpush.msra.mxu2 %v2534_v24  ;;  %1362 = vmatpush.msrb.mxu0 %v2537_v28  ;;  %v1148_v51 = vmul.f32 %v1113_v40, %v2588_v14 }
  0xc5   : > { %767 = vmatmul.f32.gmra.mxu0 %v747_v33  ;;  %1233 = vmatmul.f32.vlgmr.msrb.gmra.mxu2 %v1215_v32 }
  0xc6   : > { %1300 = vmatmul.f32.vlgmr.msrb.gmra.mxu3 %v1282_v29  ;;  %1161 = vmatpush.msra.mxu1 %v2535_v25 }
  0xc7   : > { %1565 = vmatpush.msra.mxu3 %v2536_v27  ;;  %1500 = vmatpush.msra.mxu2 %v2534_v24 }
  0xc8   : > { %1162 = vmatpush.msra.mxu1 %v2535_v25  ;;  %1363 = vmatpush.msrb.mxu0 %v2537_v28 }
  0xc9   : > { %1566 = vmatpush.msra.mxu3 %v2536_v27  ;;  %2367 = vmatpush.msk.msrb.mxu2 %vm1589_vm1, %v2538_v41 }
  0xca   : > { %v845_v36 = vpop.permute.xlu1 %844  ;;  %v1046_v37 = vpop.permute.xlu0 %1045  ;;  %1163 = vmatpush.msra.mxu1 %v2535_v25  ;;  %1364 = vmatpush.msrb.mxu0 %v2537_v28 }
  0xcb   : > { %v880_v38 = vmul.f32 %v845_v36, %v2588_v14  ;;  %v1081_v39 = vmul.f32 %v1046_v37, %v2588_v14  ;;  %1567 = vmatpush.msra.mxu3 %v2536_v27  ;;  %2368 = vmatpush.msrb.mxu2 %v2538_v41  ;;  %v1517_v49 = vpop.permute.xlu2 %1516 }
  0xcc   : > { %1164 = vmatpush.msra.mxu1 %v2535_v25  ;;  %1365 = vmatpush.msrb.mxu0 %v2537_v28  ;;  %v1551_v59 = vmul.f32 %v1517_v49, %v2590_v15 }
  0xcd   : > { %898 = vmatmul.f32.vlgmr.msra.gmra.mxu0 %v880_v38  ;;  %1099 = vmatmul.f32.vlgmr.msrb.gmra.mxu1 %v1081_v39 }
  0xce   : > { %1236 = vmatmul.f32.gmra.mxu2 %v1216_v35  ;;  %1165 = vmatpush.msra.mxu1 %v2535_v25 }
  0xcf   : > { %1366 = vmatpush.msrb.mxu0 %v2537_v28  ;;  %2372 = vmatpush.msk.msrb.mxu3 %vm1656_vm3, %v2540_v44 }
  0xd0   : > { %2352 = vmatpush.msk.msrb.mxu1 %vm1389_vm2, %v2539_v42  ;;  %2369 = vmatpush.msrb.mxu2 %v2538_v41 }
  0xd1   : > { %2355 = vmatpush.msk.msra.mxu0 %vm1589_vm1, %v2538_v41  ;;  %2373 = vmatpush.msrb.mxu3 %v2540_v44 }
  0xd2   : > { %v1048_v45 = vpop.permute.xlu1 %1047  ;;  %v1249_v46 = vpop.permute.xlu0 %1248  ;;  %1429 = vmatpush.msrb.mxu1 %v2539_v42  ;;  %2370 = vmatpush.msrb.mxu2 %v2538_v41 }
  0xd3   : > { %v1082_v47 = vmul.f32 %v1048_v45, %v2590_v15  ;;  %v1283_v48 = vmul.f32 %v1249_v46, %v2590_v15  ;;  %1631 = vmatpush.msra.mxu0 %v2538_v41  ;;  %2374 = vmatpush.msrb.mxu3 %v2540_v44  ;;  %v1584_v57 = vpop.permute.xlu2 %1583 }
  0xd4   : > { %1430 = vmatpush.msrb.mxu1 %v2539_v42  ;;  %2371 = vmatpush.msrb.mxu2 %v2538_v41  ;;  %v1618_v3 = vmul.f32 %v1584_v57, %v2590_v15 }
  0xd5   : > { %901 = vmatmul.f32.gmra.mxu0 %v881_v43  ;;  %1102 = vmatmul.f32.gmra.mxu1 %v1082_v47 }
  0xd6   : > { %1303 = vmatmul.f32.gmra.mxu3 %v1283_v48  ;;  %1431 = vmatpush.msrb.mxu1 %v2539_v42  ;;  %v243_v48 = vmul.f32 %v2588_v14, %v2588_v14 }
  0xd7   : > { %1632 = vmatpush.msra.mxu0 %v2538_v41  ;;  %2375 = vmatpush.msrb.mxu3 %v2540_v44 }
  0xd8   : > { %1432 = vmatpush.msrb.mxu1 %v2539_v42 }
  0xd9   : > { %1633 = vmatpush.msra.mxu0 %v2538_v41  ;;  %2376 = vmatpush.msrb.mxu3 %v2540_v44 }
  0xda   : > { %v1515_v52 = vpop.permute.xlu1 %1514  ;;  %v1448_v53 = vpop.permute.xlu0 %1447  ;;  %1433 = vmatpush.msrb.mxu1 %v2539_v42 }
  0xdb   : > { %v1550_v54 = vmul.f32 %v1515_v52, %v2588_v14  ;;  %v1483_v55 = vmul.f32 %v1448_v53, %v2588_v14  ;;  %1634 = vmatpush.msra.mxu0 %v2538_v41  ;;  %v1582_v2 = vpop.permute.xlu2 %1581 }
  0xdc   : > { %v1617_v17 = vmul.f32 %v1582_v2, %v2588_v14 }
  0xdd   : > { %1166 = vmatmul.f32.vlgmr.msra.gmra.mxu1 %v1148_v51  ;;  %1501 = vmatmul.f32.vlgmr.msra.gmra.mxu2 %v1483_v55  ;;  %v244_v55 = vmul.f32 %v2590_v15, %v2590_v15 }
  0xde   : > { %1568 = vmatmul.f32.vlgmr.msra.gmra.mxu3 %v1550_v54  ;;  %1765 = vmatpush.msra.mxu2 %v2541_v56 }
  0xdf   : > { %2357 = vmatpush.msk.msra.mxu3 %vm1789_vm4, %v2542_v58  ;;  %2356 = vmatpush.msk.msra.mxu1 %vm1656_vm3, %v2540_v44 }
  0xe0   : > { %1766 = vmatpush.msra.mxu2 %v2541_v56 }
  0xe1   : > { %1833 = vmatpush.msra.mxu3 %v2542_v58  ;;  %1698 = vmatpush.msra.mxu1 %v2540_v44 }
  0xe2   : > { %v1450_v60 = vpop.permute.xlu1 %1449  ;;  %v1314_v61 = vpop.permute.xlu0 %1313  ;;  %1767 = vmatpush.msra.mxu2 %v2541_v56 }
  0xe3   : > { %v1484_v62 = vmul.f32 %v1450_v60, %v2590_v15  ;;  %v1349_v63 = vmul.f32 %v1314_v61, %v2588_v14  ;;  %1834 = vmatpush.msra.mxu3 %v2542_v58  ;;  %1699 = vmatpush.msra.mxu1 %v2540_v44  ;;  %v1383_v13 = vpop.permute.xlu2 %1382 }
  0xe4   : > { %1768 = vmatpush.msra.mxu2 %v2541_v56  ;;  %v1417_v20 = vmul.f32 %v1383_v13, %v2590_v15 }
  0xe5   : > { %1367 = vmatmul.f32.vlgmr.msrb.gmra.mxu0 %v1349_v63  ;;  %1504 = vmatmul.f32.gmra.mxu2 %v1484_v62 }
  0xe6   : > { %1571 = vmatmul.f32.gmra.mxu3 %v1551_v59  ;;  %2358 = vmatpush.msk.msrb.mxu0 %vm1856_vm5, %v2543_v0 }
  0xe7   : > { %1835 = vmatpush.msra.mxu3 %v2542_v58  ;;  %1700 = vmatpush.msra.mxu1 %v2540_v44  ;;  %v2548_v58 = vmov 30.0  }
  0xe8   : > { %1900 = vmatpush.msrb.mxu0 %v2543_v0 }
  0xe9   : > { %1701 = vmatpush.msra.mxu1 %v2540_v44 }
  0xea   : > { %v1316_v4 = vpop.permute.xlu1 %1315  ;;  %v1115_v5 = vpop.permute.xlu0 %1114  ;;  %1901 = vmatpush.msrb.mxu0 %v2543_v0 }
  0xeb   : > { %v1350_v6 = vmul.f32 %v1316_v4, %v2590_v15  ;;  %v1149_v7 = vmul.f32 %v1115_v5, %v2590_v15  ;;  %v1649_v25 = vpop.permute.xlu2 %1648 }
  0xec   : > { %1902 = vmatpush.msrb.mxu0 %v2543_v0  ;;  %v1684_v26 = vmul.f32 %v1649_v25, %v2588_v14 }
  0xed   : > { %1169 = vmatmul.f32.gmra.mxu1 %v1149_v7  ;;  %1370 = vmatmul.f32.gmra.mxu0 %v1350_v6 }
  0xee   : > { %1638 = vmatmul.f32.vlgmr.msrb.gmra.mxu2 %v1618_v3 }
  0xef   : > { %2360 = vmatpush.msk.msrb.mxu2 %vm1989_vm6, %v2544_v8 }
  0xf1   : > { %2035 = vmatpush.msrb.mxu2 %v2544_v8 }
  0xf2   : > { %v1381_v9 = vpop.permute.xlu1 %1380  ;;  %v1651_v10 = vpop.permute.xlu0 %1650 }
  0xf3   : > { %v1416_v11 = vmul.f32 %v1381_v9, %v2588_v14  ;;  %v1685_v12 = vmul.f32 %v1651_v10, %v2590_v15  ;;  %2036 = vmatpush.msrb.mxu2 %v2544_v8 }
  0xf4   : > { %v2051_v31 = vpop.permute.xlu2 %2050 }
  0xf5   : > { %1434 = vmatmul.f32.vlgmr.msrb.gmra.mxu1 %v1416_v11  ;;  %1705 = vmatmul.f32.vlgmr.msrb.gmra.mxu3 %v1685_v12  ;;  %v2086_v34 = vmul.f32 %v2051_v31, %v2588_v14 }
  0xf6   : > { %1635 = vmatmul.f32.vlgmr.msra.gmra.mxu0 %v1617_v17  ;;  %2361 = vmatpush.msk.msrb.mxu3 %vm2056_vm7, %v2545_v16 }
  0xf7   : > { %2117 = vmatpush.msra.mxu0 %v2546_v18  ;;  %2359 = vmatpush.msk.msrb.mxu1 %vm1922_vm8, %v2547_v19 }
  0xf8   : > { %2102 = vmatpush.msrb.mxu3 %v2545_v16 }
  0xf9   : > { %2118 = vmatpush.msra.mxu0 %v2546_v18  ;;  %1968 = vmatpush.msrb.mxu1 %v2547_v19 }
  0xfa   : > { %v1783_v21 = vpop.permute.xlu1 %1782  ;;  %v1716_v22 = vpop.permute.xlu0 %1715  ;;  %2103 = vmatpush.msrb.mxu3 %v2545_v16 }
  0xfb   : > { %v1818_v23 = vmul.f32 %v1783_v21, %v2588_v14  ;;  %v1751_v24 = vmul.f32 %v1716_v22, %v2588_v14  ;;  %2119 = vmatpush.msra.mxu0 %v2546_v18  ;;  %1969 = vmatpush.msrb.mxu1 %v2547_v19 }
  0xfc   : > { %v1986_v37 = vpop.permute.xlu2 %1985 }
  0xfd   : > { %1437 = vmatmul.f32.gmra.mxu1 %v1417_v20  ;;  %1769 = vmatmul.f32.vlgmr.msra.gmra.mxu2 %v1751_v24  ;;  %v2020_v40 = vmul.f32 %v1986_v37, %v2590_v15 }
  0xfe   : > { %1836 = vmatmul.f32.vlgmr.msra.gmra.mxu3 %v1818_v23  ;;  %2120 = vmatpush.msra.mxu0 %v2546_v18 }
 0x100   : > { %2121 = vmatpush.msra.mxu0 %v2546_v18 }
 0x102   : > { %v1785_v27 = vpop.permute.xlu1 %1784  ;;  %v1718_v28 = vpop.permute.xlu0 %1717  ;;  %2122 = vmatpush.msra.mxu0 %v2546_v18 }
 0x103   : > { %v1819_v29 = vmul.f32 %v1785_v27, %v2590_v15  ;;  %v1752_v30 = vmul.f32 %v1718_v28, %v2590_v15 }
 0x104   : > { %2123 = vmatpush.msra.mxu0 %v2546_v18 }
 0x105   : > { %1702 = vmatmul.f32.vlgmr.msra.gmra.mxu1 %v1684_v26  ;;  %1772 = vmatmul.f32.gmra.mxu2 %v1752_v30 }
 0x106   : > { %1839 = vmatmul.f32.gmra.mxu3 %v1819_v29  ;;  %2124 = vmatpush.msra.mxu0 %v2546_v18 }
 0x108   : > { %2125 = vmatpush.msra.mxu0 %v2546_v18 }
 0x10a   : > { %v1984_v32 = vpop.permute.xlu1 %1983  ;;  %v1850_v33 = vpop.permute.xlu0 %1849  ;;  %2126 = vmatpush.msra.mxu0 %v2546_v18 }
 0x10b   : > { %v2019_v35 = vmul.f32 %v1984_v32, %v2588_v14  ;;  %v1885_v36 = vmul.f32 %v1850_v33, %v2588_v14  ;;  %v363_v44 = vpop.f32.mrf.mxu1 }
 0x10c   : > { %2127 = vmatpush.msra.mxu0 %v2546_v18 }
 0x10d   : > { %1903 = vmatmul.f32.vlgmr.msrb.gmra.mxu0 %v1885_v36  ;;  %2037 = vmatmul.f32.vlgmr.msrb.gmra.mxu2 %v2019_v35 }
 0x10e   : > { %2104 = vmatmul.f32.vlgmr.msrb.gmra.mxu3 %v2086_v34  ;;  %2128 = vmatpush.msra.mxu0 %v2546_v18 }
 0x110   : > { %2129 = vmatpush.msra.mxu0 %v2546_v18  ;;  %v430_v43 = vpop.f32.mrf.mxu2 }
 0x112   : > { %v1852_v38 = vpop.permute.xlu1 %1851  ;;  %v1917_v39 = vpop.permute.xlu0 %1916  ;;  %2130 = vmatpush.msra.mxu0 %v2546_v18 }
 0x113   : > { %v1886_v41 = vmul.f32 %v1852_v38, %v2590_v15  ;;  %v1952_v42 = vmul.f32 %v1917_v39, %v2588_v14  ;;  %v366_v51 = vpop.f32.mrf.mxu1 }
 0x114   : > { %2131 = vmatpush.msra.mxu0 %v2546_v18 }
 0x115   : > { %1906 = vmatmul.f32.gmra.mxu0 %v1886_v41  ;;  %1970 = vmatmul.f32.vlgmr.msrb.gmra.mxu1 %v1952_v42 }
 0x116   : > { %2040 = vmatmul.f32.gmra.mxu2 %v2020_v40  ;;  %2132 = vmatpush.msra.mxu0 %v2546_v18 }
 0x118   : > { %v497_v45 = vpop.f32.mrf.mxu3  ;;  %v433_v52 = vpop.f32.mrf.mxu2 }
 0x11a   : > { %v1919_v46 = vpop.permute.xlu1 %1918  ;;  %v2053_v47 = vpop.permute.xlu0 %2052 }
 0x11b   : > { %v1953_v49 = vmul.f32 %v1919_v46, %v2590_v15  ;;  %v2087_v50 = vmul.f32 %v2053_v47, %v2590_v15  ;;  %v564_v62 = vpop.f32.mrf.mxu1 }
 0x11d   : > { %1973 = vmatmul.f32.gmra.mxu1 %v1953_v49  ;;  %2107 = vmatmul.f32.gmra.mxu3 %v2087_v50 }
 0x11e   : > { %2133 = vmatmul.f32.vlgmr.msra.gmra.mxu0 %v243_v48 }
 0x120   : > { %v500_v53 = vpop.f32.mrf.mxu3  ;;  %v631_v3 = vpop.f32.mrf.mxu2 }
 0x122   : > { %v300_v54 = vpop.f32.mrf.mxu0 }
 0x123   : > { %v306_v56 = vmax.f32 %v300_v54, -1e+30 }
 0x125   : > { %vm369_vm9 = vcmp.gt.f32.partialorder %v363_v44, %v306_v56  ;;  %v371_v57 = vmax.f32 %v306_v56, %v363_v44 }
 0x126   : > { %v373_v59 = vsel %vm369_vm9, 33.0, %v2548_v58  ;;  %2136 = vmatmul.f32.gmra.mxu0 %v244_v55 }
 0x127   : > { %vm436_vm10 = vcmp.gt.f32.partialorder %v430_v43, %v371_v57  ;;  %v438_v14 = vmax.f32 %v371_v57, %v430_v43 }
 0x128   : > { %v440_v60 = vsel %vm436_vm10, 36.0, %v373_v59  ;;  %v698_v15 = vpop.f32.mrf.mxu3 }
 0x129   : > { %vm503_vm11 = vcmp.gt.f32.partialorder %v497_v45, %v438_v14  ;;  %v505_v61 = vmax.f32 %v438_v14, %v497_v45  ;;  %v634_v19 = vpop.f32.mrf.mxu2 }
 0x12a   : > { %v507_v63 = vsel %vm503_vm11, 39.0, %v440_v60  ;;  %v303_v0 = vpop.f32.mrf.mxu0  ;;  %v567_v13 = vpop.f32.mrf.mxu1 }
 0x12b   : > { %vm570_vm12 = vcmp.gt.f32.partialorder %v564_v62, %v505_v61  ;;  %v572_v1 = vmax.f32 %v505_v61, %v564_v62  ;;  %v307_v2 = vmax.f32 %v303_v0, -1e+30 }
 0x12c   : > { %v574_v4 = vsel %vm570_vm12, 42.0, %v507_v63 }
 0x12d   : > { %vm637_vm13 = vcmp.gt.f32.partialorder %v631_v3, %v572_v1  ;;  %v639_v5 = vmax.f32 %v572_v1, %v631_v3  ;;  %vm370_vm14 = vcmp.gt.f32.partialorder %v366_v51, %v307_v2  ;;  %v372_v6 = vmax.f32 %v307_v2, %v366_v51 }
 0x12e   : > { %v641_v7 = vsel %vm637_vm13, 45.0, %v574_v4  ;;  %v374_v8 = vsel %vm370_vm14, 33.0, %v2548_v58 }
 0x12f   : > { %vm704_vm15 = vcmp.gt.f32.partialorder %v698_v15, %v639_v5  ;;  %vm437_vm0 = vcmp.gt.f32.partialorder %v433_v52, %v372_v6  ;;  %v439_v17 = vmax.f32 %v372_v6, %v433_v52  ;;  %v706_v34 = vmax.f32 %v639_v5, %v698_v15 }
 0x130   : > { %v708_v9 = vsel %vm704_vm15, 48.0, %v641_v7  ;;  %v441_v10 = vsel %vm437_vm0, 36.0, %v374_v8 }
 0x131   : > { %vm504_vm1 = vcmp.gt.f32.partialorder %v500_v53, %v439_v17  ;;  %v506_v11 = vmax.f32 %v439_v17, %v500_v53  ;;  %v701_v22 = vpop.f32.mrf.mxu3  ;;  %v1033_v27 = vpop.f32.mrf.mxu2 }
 0x132   : > { %v508_v12 = vsel %vm504_vm1, 39.0, %v441_v10  ;;  %v765_v25 = vpop.f32.mrf.mxu0 }
 0x133   : > { %vm571_vm2 = vcmp.gt.f32.partialorder %v567_v13, %v506_v11  ;;  %v573_v16 = vmax.f32 %v506_v11, %v567_v13  ;;  %v966_v24 = vpop.f32.mrf.mxu1  ;;  %v773_v37 = vmax.f32 %v706_v34, %v765_v25  ;;  %vm771_vm5 = vcmp.gt.f32.partialorder %v765_v25, %v706_v34 }
 0x134   : > { %v575_v18 = vsel %vm571_vm2, 42.0, %v508_v12  ;;  %v775_v58 = vsel %vm771_vm5, 51.0, %v708_v9 }
 0x135   : > { %vm638_vm3 = vcmp.gt.f32.partialorder %v634_v19, %v573_v16  ;;  %v640_v20 = vmax.f32 %v573_v16, %v634_v19 }
 0x136   : > { %v642_v21 = vsel %vm638_vm3, 45.0, %v575_v18 }
 0x137   : > { %vm705_vm4 = vcmp.gt.f32.partialorder %v701_v22, %v640_v20  ;;  %v707_v40 = vmax.f32 %v640_v20, %v701_v22 }
 0x138   : > { %v709_v23 = vsel %vm705_vm4, 48.0, %v642_v21 }
 0x139   : > { %v832_v28 = vpop.f32.mrf.mxu3 }
 0x13a   : > { %v840_v39 = vmax.f32 %v773_v37, %v832_v28  ;;  %vm838_vm6 = vcmp.gt.f32.partialorder %v832_v28, %v773_v37 }
 0x13b   : > { %v2861_v26 = vpop.f32.mrf.mxu1  ;;  %v842_v59 = vsel %vm838_vm6, 54.0, %v775_v58 }
 0x140   : > { %v2863_v31 = vpop.f32.mrf.mxu2 }
 0x141   : > { %v835_v32 = vpop.f32.mrf.mxu3 }
 0x142   : > { %v768_v29 = vpop.f32.mrf.mxu0 }
 0x143   : > { %v774_v42 = vmax.f32 %v707_v40, %v768_v29  ;;  %vm772_vm8 = vcmp.gt.f32.partialorder %v768_v29, %v707_v40 }
 0x144   : > { %v776_v0 = vsel %vm772_vm8, 51.0, %v709_v23 }
 0x145   : > { %v841_v48 = vmax.f32 %v774_v42, %v835_v32  ;;  %vm839_vm10 = vcmp.gt.f32.partialorder %v835_v32, %v774_v42 }
 0x146   : > { %v843_v5 = vsel %vm839_vm10, 54.0, %v776_v0 }
 0x148   : > { %v2867_v36 = vpop.f32.mrf.mxu2 }
 0x149   : > { %v2869_v38 = vpop.f32.mrf.mxu3 }
 0x14a   : > { %v1100_v30 = vpop.f32.mrf.mxu1  ;;  %v899_v33 = vpop.f32.mrf.mxu0 }
 0x14b   : > { %v907_v41 = vmax.f32 %v840_v39, %v899_v33  ;;  %vm905_vm7 = vcmp.gt.f32.partialorder %v899_v33, %v840_v39 }
 0x14c   : > { %v909_v14 = vsel %vm905_vm7, 57.0, %v842_v59 }
 0x14d   : > { %v974_v45 = vmax.f32 %v907_v41, %v966_v24  ;;  %vm972_vm9 = vcmp.gt.f32.partialorder %v966_v24, %v907_v41 }
 0x14e   : > { %v976_v3 = vsel %vm972_vm9, 60.0, %v909_v14 }
 0x14f   : > { %v1041_v50 = vmax.f32 %v974_v45, %v1033_v27  ;;  %vm1039_vm11 = vcmp.gt.f32.partialorder %v1033_v27, %v974_v45 }
 0x150   : > { %v1043_v6 = vsel %vm1039_vm11, 63.0, %v976_v3 }
 0x151   : > { %v2871_v44 = vpop.f32.mrf.mxu2  ;;  %v1108_v53 = vmax.f32 %v1041_v50, %v1100_v30  ;;  %vm1106_vm13 = vcmp.gt.f32.partialorder %v1100_v30, %v1041_v50 }
 0x152   : > { %v2865_v35 = vpop.f32.mrf.mxu1  ;;  %v902_v43 = vpop.f32.mrf.mxu0  ;;  %v1110_v10 = vsel %vm1106_vm13, 66.0, %v1043_v6 }
 0x153   : > { %v908_v49 = vmax.f32 %v841_v48, %v902_v43  ;;  %vm906_vm12 = vcmp.gt.f32.partialorder %v902_v43, %v841_v48 }
 0x154   : > { %v910_v8 = vsel %vm906_vm12, 57.0, %v843_v5 }
 0x155   : > { %v975_v51 = vmax.f32 %v908_v49, %v2861_v26  ;;  %vm973_vm14 = vcmp.gt.f32.partialorder %v2861_v26, %v908_v49 }
 0x156   : > { %v977_v13 = vsel %vm973_vm14, 60.0, %v910_v8 }
 0x157   : > { %v1042_v57 = vmax.f32 %v975_v51, %v2863_v31  ;;  %vm1040_vm0 = vcmp.gt.f32.partialorder %v2863_v31, %v975_v51 }
 0x158   : > { %v1044_v22 = vsel %vm1040_vm0, 63.0, %v977_v13 }
 0x159   : > { %v2873_v46 = vpop.f32.mrf.mxu3  ;;  %v1109_v61 = vmax.f32 %v1042_v57, %v2865_v35  ;;  %vm1107_vm2 = vcmp.gt.f32.partialorder %v2865_v35, %v1042_v57 }
 0x15a   : > { %v1167_v47 = vpop.f32.mrf.mxu1  ;;  %v1111_v25 = vsel %vm1107_vm2, 66.0, %v1044_v22 }
 0x15b   : > { %v1175_v56 = vmax.f32 %v1108_v53, %v1167_v47  ;;  %vm1173_vm15 = vcmp.gt.f32.partialorder %v1167_v47, %v1108_v53 }
 0x15c   : > { %v1177_v16 = vsel %vm1173_vm15, 69.0, %v1110_v10 }
 0x15d   : > { %v1242_v60 = vmax.f32 %v1175_v56, %v2867_v36  ;;  %vm1240_vm1 = vcmp.gt.f32.partialorder %v2867_v36, %v1175_v56 }
 0x15e   : > { %v1244_v23 = vsel %vm1240_vm1, 72.0, %v1177_v16 }
 0x15f   : > { %v1309_v15 = vmax.f32 %v1242_v60, %v2869_v38  ;;  %vm1307_vm3 = vcmp.gt.f32.partialorder %v2869_v38, %v1242_v60 }
 0x160   : > { %v2876_v52 = vpop.f32.mrf.mxu2  ;;  %v1311_v26 = vsel %vm1307_vm3, 75.0, %v1244_v23 }
 0x161   : > { %v2878_v54 = vpop.f32.mrf.mxu3 }
 0x162   : > { %v1368_v62 = vpop.f32.mrf.mxu0 }
 0x163   : > { %v1376_v7 = vmax.f32 %v1309_v15, %v1368_v62  ;;  %vm1374_vm4 = vcmp.gt.f32.partialorder %v1368_v62, %v1309_v15 }
 0x164   : > { %v1378_v28 = vsel %vm1374_vm4, 78.0, %v1311_v26 }
 0x168   : > { %v2883_v63 = vpop.f32.mrf.mxu2 }
 0x169   : > { %v2885_v1 = vpop.f32.mrf.mxu3 }
 0x16a   : > { %v1170_v55 = vpop.f32.mrf.mxu1  ;;  %v1371_v11 = vpop.f32.mrf.mxu0 }
 0x16b   : > { %v1176_v4 = vmax.f32 %v1109_v61, %v1170_v55  ;;  %vm1174_vm5 = vcmp.gt.f32.partialorder %v1170_v55, %v1109_v61 }
 0x16c   : > { %v1178_v29 = vsel %vm1174_vm5, 69.0, %v1111_v25 }
 0x16d   : > { %v1243_v17 = vmax.f32 %v1176_v4, %v2871_v44  ;;  %vm1241_vm7 = vcmp.gt.f32.partialorder %v2871_v44, %v1176_v4 }
 0x16e   : > { %v1245_v36 = vsel %vm1241_vm7, 72.0, %v1178_v29 }
 0x16f   : > { %v1310_v20 = vmax.f32 %v1243_v17, %v2873_v46  ;;  %vm1308_vm9 = vcmp.gt.f32.partialorder %v2873_v46, %v1243_v17 }
 0x170   : > { %v1312_v41 = vsel %vm1308_vm9, 75.0, %v1245_v36 }
 0x171   : > { %v2890_v12 = vpop.f32.mrf.mxu2  ;;  %v1377_v24 = vmax.f32 %v1310_v20, %v1371_v11  ;;  %vm1375_vm11 = vcmp.gt.f32.partialorder %v1371_v11, %v1310_v20 }
 0x172   : > { %v1435_v2 = vpop.f32.mrf.mxu1  ;;  %v1379_v47 = vsel %vm1375_vm11, 78.0, %v1312_v41 }
 0x173   : > { %v1443_v9 = vmax.f32 %v1376_v7, %v1435_v2  ;;  %vm1441_vm6 = vcmp.gt.f32.partialorder %v1435_v2, %v1376_v7  ;;  %v1636_v30 = vpop.f32.mrf.mxu0 }
 0x174   : > { %v1445_v33 = vsel %vm1441_vm6, 81.0, %v1378_v28 }
 0x175   : > { %v1510_v21 = vmax.f32 %v1443_v9, %v2876_v52  ;;  %vm1508_vm8 = vcmp.gt.f32.partialorder %v2876_v52, %v1443_v9 }
 0x176   : > { %v1512_v38 = vsel %vm1508_vm8, 84.0, %v1445_v33 }
 0x177   : > { %v1577_v27 = vmax.f32 %v1510_v21, %v2878_v54  ;;  %vm1575_vm10 = vcmp.gt.f32.partialorder %v2878_v54, %v1510_v21 }
 0x178   : > { %v2894_v18 = vpop.f32.mrf.mxu3  ;;  %v1579_v42 = vsel %vm1575_vm10, 87.0, %v1512_v38 }
 0x179   : > { %v1644_v37 = vmax.f32 %v1577_v27, %v1636_v30  ;;  %vm1642_vm12 = vcmp.gt.f32.partialorder %v1636_v30, %v1577_v27 }
 0x17a   : > { %v1438_v19 = vpop.f32.mrf.mxu1  ;;  %v1646_v48 = vsel %vm1642_vm12, 90.0, %v1579_v42 }
 0x17b   : > { %v1444_v31 = vmax.f32 %v1377_v24, %v1438_v19  ;;  %vm1442_vm13 = vcmp.gt.f32.partialorder %v1438_v19, %v1377_v24 }
 0x17c   : > { %v1446_v46 = vsel %vm1442_vm13, 81.0, %v1379_v47 }
 0x17d   : > { %v1511_v39 = vmax.f32 %v1444_v31, %v2883_v63  ;;  %vm1509_vm15 = vcmp.gt.f32.partialorder %v2883_v63, %v1444_v31 }
 0x17e   : > { %v1513_v54 = vsel %vm1509_vm15, 84.0, %v1446_v46 }
 0x17f   : > { %v1578_v43 = vmax.f32 %v1511_v39, %v2885_v1  ;;  %vm1576_vm1 = vcmp.gt.f32.partialorder %v2885_v1, %v1511_v39 }
 0x180   : > { %v1770_v32 = vpop.f32.mrf.mxu2  ;;  %v1580_v58 = vsel %vm1576_vm1, 87.0, %v1513_v54 }
 0x181   : > { %v1837_v34 = vpop.f32.mrf.mxu3  ;;  %v1645_v52 = vmax.f32 %v1578_v43, %v2890_v12  ;;  %vm1643_vm4 = vcmp.gt.f32.partialorder %v2890_v12, %v1578_v43 }
 0x182   : > { %v1703_v35 = vpop.f32.mrf.mxu1  ;;  %v1647_v1 = vsel %vm1643_vm4, 90.0, %v1580_v58 }
 0x183   : > { %v1711_v40 = vmax.f32 %v1644_v37, %v1703_v35  ;;  %vm1709_vm14 = vcmp.gt.f32.partialorder %v1703_v35, %v1644_v37  ;;  %v1712_v56 = vmax.f32 %v1645_v52, %v2894_v18  ;;  %vm1710_vm6 = vcmp.gt.f32.partialorder %v2894_v18, %v1645_v52 }
 0x184   : > { %v1713_v50 = vsel %vm1709_vm14, 93.0, %v1646_v48  ;;  %v1714_v6 = vsel %vm1710_vm6, 93.0, %v1647_v1 }
 0x185   : > { %v1778_v44 = vmax.f32 %v1711_v40, %v1770_v32  ;;  %vm1776_vm0 = vcmp.gt.f32.partialorder %v1770_v32, %v1711_v40 }
 0x186   : > { %v1780_v55 = vsel %vm1776_vm0, 96.0, %v1713_v50 }
 0x187   : > { %v1845_v53 = vmax.f32 %v1778_v44, %v1837_v34  ;;  %vm1843_vm2 = vcmp.gt.f32.partialorder %v1837_v34, %v1778_v44 }
 0x188   : > { %v1773_v49 = vpop.f32.mrf.mxu2  ;;  %v1847_v59 = vsel %vm1843_vm2, 99.0, %v1780_v55 }
 0x189   : > { %v1840_v51 = vpop.f32.mrf.mxu3  ;;  %v1779_v61 = vmax.f32 %v1712_v56, %v1773_v49  ;;  %vm1777_vm8 = vcmp.gt.f32.partialorder %v1773_v49, %v1712_v56 }
 0x18a   : > { %v1904_v45 = vpop.f32.mrf.mxu0  ;;  %v1781_v8 = vsel %vm1777_vm8, 96.0, %v1714_v6 }
 0x18b   : > { %vm1910_vm3 = vcmp.gt.f32.partialorder %v1904_v45, %v1845_v53  ;;  %v1912_v57 = vmax.f32 %v1845_v53, %v1904_v45  ;;  %v1846_v5 = vmax.f32 %v1779_v61, %v1840_v51  ;;  %vm1844_vm10 = vcmp.gt.f32.partialorder %v1840_v51, %v1779_v61 }
 0x18c   : > { %v1914_v62 = vsel %vm1910_vm3, 102.0, %v1847_v59  ;;  %v1848_v13 = vsel %vm1844_vm10, 99.0, %v1781_v8  ;;  %vm2172_vm3 = vcmask 7168  }
 0x190   : > { %v2038_v0 = vpop.f32.mrf.mxu2 }
 0x191   : > { %v2105_v3 = vpop.f32.mrf.mxu3 }
 0x192   : > { %v1907_v14 = vpop.f32.mrf.mxu0  ;;  %v1971_v60 = vpop.f32.mrf.mxu1 }
 0x193   : > { %vm1977_vm5 = vcmp.gt.f32.partialorder %v1971_v60, %v1912_v57  ;;  %v1979_v63 = vmax.f32 %v1912_v57, %v1971_v60  ;;  %v1913_v17 = vmax.f32 %v1846_v5, %v1907_v14  ;;  %vm1911_vm11 = vcmp.gt.f32.partialorder %v1907_v14, %v1846_v5 }
 0x194   : > { %v1981_v2 = vsel %vm1977_vm5, 105.0, %v1914_v62  ;;  %v1915_v18 = vsel %vm1911_vm11, 102.0, %v1848_v13 }
 0x195   : > { %vm2044_vm7 = vcmp.gt.f32.partialorder %v2038_v0, %v1979_v63  ;;  %v2046_v4 = vmax.f32 %v1979_v63, %v2038_v0 }
 0x196   : > { %v2048_v15 = vsel %vm2044_vm7, 108.0, %v1981_v2 }
 0x197   : > { %vm2111_vm9 = vcmp.gt.f32.partialorder %v2105_v3, %v2046_v4  ;;  %v2113_v27 = vmax.f32 %v2046_v4, %v2105_v3 }
 0x198   : > { %v2115_v7 = vsel %vm2111_vm9, 111.0, %v2048_v15 }
 0x199   : > { %2459 = vrcp.f32 %v2115_v7  ;;  %v2041_v12 = vpop.f32.mrf.mxu2  ;;  %v2153_v28 = vand.u32 2147483648, %v2115_v7  ;;  %v2151_v32 = vand.u32 2147483647, %v2115_v7  ;;  %vm2147_vm0 = vweird.f32 %v2115_v7 }
 0x19a   : > { %v1974_v9 = vpop.f32.mrf.mxu1 }
 0x19b   : > { %vm1978_vm12 = vcmp.gt.f32.partialorder %v1974_v9, %v1913_v17  ;;  %v1980_v10 = vmax.f32 %v1913_v17, %v1974_v9  ;;  %v2134_v11 = vpop.f32.mrf.mxu0  ;;  %v2154_v36 = vor.u32 1.1754944e-38, %v2153_v28  ;;  %vm2152_vm2 = vcmp.eq.f32.partialorder %v2151_v32, 8.507059e+37 }
 0x19c   : > { %v2135_v16 = vadd.f32 1e-08, %v2134_v11  ;;  %v1982_v19 = vsel %vm1978_vm12, 105.0, %v1915_v18 }
 0x19d   : > { %vm2045_vm13 = vcmp.gt.f32.partialorder %v2041_v12, %v1980_v10  ;;  %v2047_v21 = vmax.f32 %v1980_v10, %v2041_v12 }
 0x19e   : > { %2461 = vrcp.f32 %v2135_v16  ;;  %v2049_v24 = vsel %vm2045_vm13, 108.0, %v1982_v19 }
 0x19f   : > { %v2460_v20 = vpop.eup %2459 }
 0x1a0   : > { %v2143_v22 = vmul.f32 %v2460_v20, %v2115_v7  ;;  %v2108_v23 = vpop.f32.mrf.mxu3  ;;  %vm2148_vm15 = vweird.f32 %v2460_v20 }
 0x1a1   : > { %vm2112_vm14 = vcmp.gt.f32.partialorder %v2108_v23, %v2047_v21  ;;  %vm2149_vm1 = vmor %vm2147_vm0, %vm2148_vm15  ;;  %v2114_v44 = vmax.f32 %v2047_v21, %v2108_v23 }
 0x1a2   : > { %v2144_v25 = vsub.f32 1.0, %v2143_v22  ;;  %v2116_v26 = vsel %vm2112_vm14, 111.0, %v2049_v24 }
 0x1a3   : > { %2463 = vrcp.f32 %v2116_v26  ;;  %v2137_v29 = vpop.f32.mrf.mxu0  ;;  %v2168_v48 = vand.u32 2147483648, %v2116_v26  ;;  %v2166_v50 = vand.u32 2147483647, %v2116_v26  ;;  %vm2162_vm5 = vweird.f32 %v2116_v26 }
 0x1a4   : > { %v2462_v30 = vpop.eup %2461  ;;  %v2145_v31 = vmul.f32 %v2460_v20, %v2144_v25  ;;  %v2138_v33 = vadd.f32 1e-08, %v2137_v29 }
 0x1a5   : > { %v2175_v34 = vmul.f32 %v2462_v30, %v2113_v27  ;;  %v2169_v53 = vor.u32 1.1754944e-38, %v2168_v48  ;;  %vm2167_vm7 = vcmp.eq.f32.partialorder %v2166_v50, 8.507059e+37 }
 0x1a6   : > { %v2146_v35 = vadd.f32 %v2460_v20, %v2145_v31  ;;  %2465 = vrcp.f32 %v2138_v33 }
 0x1a7   : > { %v2177_v37 = vmax.f32 %v2175_v34, 0.0 }
 0x1a8   : > { %v2150_v38 = vsel %vm2149_vm1, %v2460_v20, %v2146_v35 }
 0x1a9   : > { %v2464_v39 = vpop.eup %2463  ;;  %v2155_v40 = vsel %vm2152_vm2, %v2154_v36, %v2150_v38  ;;  %v2179_v41 = vmin.f32 %v2177_v37, 1.0 }
 0x1aa   : > { %v2156_v42 = vmul.f32 16000.0, %v2155_v40  ;;  %v2158_v43 = vmul.f32 %v2464_v39, %v2116_v26  ;;  %vm2163_vm4 = vweird.f32 %v2464_v39 }
 0x1ab   : > { %2181 = vst.msk [vmem:[%s205_s24] sm:$0xff] %vm2172_vm3, %v2179_v41  ;;  %vm2164_vm6 = vmor %vm2162_vm5, %vm2163_vm4 }
 0x1ac   : > { %v2466_v45 = vpop.eup %2465  ;;  %2173 = vst.msk [vmem:[%s195_s9] sm:$0xff] %vm2172_vm3, %v2156_v42  ;;  %v2159_v47 = vsub.f32 1.0, %v2158_v43 }
 0x1ad   : > { %v2176_v49 = vmul.f32 %v2466_v45, %v2114_v44 }
 0x1ae   : > { %v2160_v46 = vmul.f32 %v2464_v39, %v2159_v47 }
 0x1af   : > { %v2178_v51 = vmax.f32 %v2176_v49, 0.0 }
 0x1b0   : > { %v2161_v52 = vadd.f32 %v2464_v39, %v2160_v46 }
 0x1b1   : > { %v2180_v54 = vmin.f32 %v2178_v51, 1.0 }
 0x1b2   : > { %v2165_v55 = vsel %vm2164_vm6, %v2464_v39, %v2161_v52 }
 0x1b3   : > { %v2170_v56 = vsel %vm2167_vm7, %v2169_v53, %v2165_v55  ;;  %2182 = vst.msk [vmem:[%s205_s24 + $0x8] sm:$0xff] %vm2172_vm3, %v2180_v54 }
 0x1b4   : > { %v2171_v57 = vmul.f32 16000.0, %v2170_v56 }
 0x1b6   : > { %2174 = vst.msk [vmem:[%s195_s9 + $0x8] sm:$0xff] %vm2172_vm3, %v2171_v57 }
 0x1b7 PF: > { %s13_s11 = sadd.s32 1, %s2489_s11   ;;  %s2936_s9 = smov %s2485_s10 }
 0x1b8   : > { %p10_p5 = scmp.ge.s32.totalorder %s13_s11, 4   ;;  %s2937_s10 = smov %s2939_s12 }
 0x1ba   :  { %12 = sbr.rel (!%p10_p5) target bundleno = 2 (0x2), region = 69 }

</bundles_post_ra>
